<compile_context>
chip_gen: v7x
topology: tpu7x:2x2x1
jax: 0.10.0
libtpu: 0.0.40
codegen_flags: <defaults>
</compile_context>

<pallas_src>
import jax
import jax.numpy as jnp
from jax.experimental import pallas as pl
from jax.experimental.pallas import tpu as pltpu

EPS = 1e-10
TILE_N = 512                      # rows per grid step (upper bound)
VMEM_LIMIT = 32 * 1024 * 1024     # explicit scoped-VMEM cap (cheap insurance on v5e)


# ------------------------------ small helpers ------------------------------ #

def _round_up(n, m):
    return ((n + m - 1) // m) * m


def _row_tile(n, tile=TILE_N):
    """Row tile (multiple of 16 so bf16 leading-axis collapses stay tile-aligned)
    and padded row count.  Aims for >= 2 grid steps when there is enough work
    (v7x has two TensorCores; v5e/v6e are unaffected)."""
    n16 = _round_up(max(n, 1), 16)
    if n16 <= 16:
        return 16, 16
    t = min(tile, _round_up((n16 + 1) // 2, 16))
    return t, _round_up(n16, t)


def _pad_axis(a, target, axis):
    n = a.shape[axis]
    if n == target:
        return a
    pad = [(0, 0)] * a.ndim
    pad[axis] = (0, target - n)
    return jnp.pad(a, pad)


def _wspec(shape):
    # VMEM-resident weight: full-array block, same block for every grid step.
    return pl.BlockSpec(shape, lambda i: (0,) * len(shape))


# ------------------------------ Pallas kernels ------------------------------ #

def _branch_kernel(feat_ref, mask_ref, tgt_ref,
                   gw1_ref, gb1_ref, wfold_ref, bfold_ref, aw1t_ref,
                   aw2_ref, ab2_ref, agw_ref, agb_ref, out_ref):
    """Fused neighbour branch, P-batched:

        gh   = relu(feat @ gw1 + gb1)                         (P*TN, D)
        xa   = gh @ [gw2 | gw2@aw1x] + [gb2 | gb2@aw1x + ab1] (P*TN, 2D)
        x    = xa[:, :D]                                      g-MLP output
        ah   = relu(xa[:, D:] + mask * (tgt @ aw1t))          attention hidden
        w    = exp(ah . aw2 + ab2) * mask
        out  = relu((sum_P w*x) / (sum_P w + eps) @ agw + agb)

    feat_ref: (P, TN, 2D) bf16 P-major; mask_ref: (P, TN, 1) f32;
    tgt_ref: (TN, D) bf16; out_ref: (TN, D) f32.
    """
    p, tn, d2 = feat_ref.shape
    d = out_ref.shape[-1]

    feat = feat_ref[...].reshape(p * tn, d2)                 # tile-aligned collapse
    gh = jnp.maximum(
        jnp.dot(feat, gw1_ref[...], preferred_element_type=jnp.float32)
        + gb1_ref[...], 0.0)                                 # (P*TN, D) f32
    xa = jnp.dot(gh, wfold_ref[...],
                 preferred_element_type=jnp.float32) + bfold_ref[...]   # (P*TN, 2D)
    x = xa[:, :d].reshape(p, tn, d)                          # (P, TN, D) f32
    a_pre = xa[:, d:].reshape(p, tn, d)                      # (P, TN, D) f32

    mask = mask_ref[...]                                     # (P, TN, 1) f32
    # second attention input is mask * tgt (constant over P): hoist the matmul
    ah_t = jnp.dot(tgt_ref[...], aw1t_ref[...],
                   preferred_element_type=jnp.float32)       # (TN, D) f32
    ah = jnp.maximum(a_pre + mask * ah_t[None], 0.0)         # (P, TN, D)
    logit = jnp.sum(ah * aw2_ref[...], axis=-1, keepdims=True) + ab2_ref[...]
    w = jnp.exp(logit) * mask                                # (P, TN, 1)  faithful to torch

    num = jnp.sum(w * x, axis=0)                             # (TN, D)
    den = jnp.sum(w, axis=0)                                 # (TN, 1)
    agg = num * pl.reciprocal(den + EPS, approx=True)
    out_ref[...] = jnp.maximum(
        jnp.dot(agg, agw_ref[...], preferred_element_type=jnp.float32)
        + agb_ref[...], 0.0)


def _attn_agg_kernel(x_ref, sec_ref, mask_ref,
                     aw1x_ref, aw1s_ref, ab1_ref, aw2_ref, ab2_ref,
                     agw_ref, agb_ref, out_ref):
    """Fused social attention, P-batched.

    x_ref, sec_ref: (P, TN, D) bf16 P-major; mask_ref: (P, TN, 1) f32; out_ref: (TN, D) f32.
    """
    p, tn, d = x_ref.shape
    x2 = x_ref[...].reshape(p * tn, d)
    s2 = sec_ref[...].reshape(p * tn, d)
    ah = jnp.maximum(
        jnp.dot(x2, aw1x_ref[...], preferred_element_type=jnp.float32)
        + jnp.dot(s2, aw1s_ref[...], preferred_element_type=jnp.float32)
        + ab1_ref[...], 0.0).reshape(p, tn, d)               # (P, TN, D) f32
    logit = jnp.sum(ah * aw2_ref[...], axis=-1, keepdims=True) + ab2_ref[...]
    mask = mask_ref[...]
    w = jnp.exp(logit) * mask                                # (P, TN, 1)

    x = x_ref[...].astype(jnp.float32)                       # f32 element-wise math
    num = jnp.sum(w * x, axis=0)
    den = jnp.sum(w, axis=0)
    agg = num * pl.reciprocal(den + EPS, approx=True)
    out_ref[...] = jnp.maximum(
        jnp.dot(agg, agw_ref[...], preferred_element_type=jnp.float32)
        + agb_ref[...], 0.0)


def _head_kernel(hii_ref, his_ref, zj_ref,
                 uw1a_ref, uw1b_ref, ub1_ref, uw2_ref, ub2_ref, uw3_ref, ub3_ref,
                 fw1a_ref, fw1b_ref, fb1_ref, fw2_ref, fb2_ref, fw3_ref, fb3_ref,
                 out_ref):
    """Fused UserModel.mlp (3x Linear+ReLU) + RecModule.mlp (Linear+ReLU x2 + Linear).
    Concats are split matmuls: cat([a, b]) @ W == a @ W_top + b @ W_bot.
    Final Linear(D, 1) is a VPU/XLU reduce (no 1-column MXU matmul)."""
    def dot(a, b):
        return jnp.dot(a, b, preferred_element_type=jnp.float32)

    h = jnp.maximum(dot(hii_ref[...], uw1a_ref[...])
                    + dot(his_ref[...], uw1b_ref[...]) + ub1_ref[...], 0.0)
    h = jnp.maximum(dot(h, uw2_ref[...]) + ub2_ref[...], 0.0)
    h = jnp.maximum(dot(h, uw3_ref[...]) + ub3_ref[...], 0.0)

    r = jnp.maximum(dot(h, fw1a_ref[...])
                    + dot(zj_ref[...], fw1b_ref[...]) + fb1_ref[...], 0.0)
    r = jnp.maximum(dot(r, fw2_ref[...]) + fb2_ref[...], 0.0)
    out_ref[...] = jnp.sum(r * fw3_ref[...], axis=-1, keepdims=True) + fb3_ref[...]


# ------------------------------ kernel wrappers ----------------------------- #

def fused_branch(feat, mask, tgt, g_params, attn_params, aggr_params, *, tile=TILE_N):
    """feat: (P, N, 2D) P-major, mask: (P, N), tgt: (N, D) -> (N, D) f32."""
    p, n, d2 = feat.shape
    d = d2 // 2
    gw1, gb1, gw2, gb2 = g_params
    aw1, ab1, aw2, ab2 = attn_params
    agw, agb = aggr_params
    aw1x, aw1t = aw1[:d], aw1[d:]

    # Fold the attention input projection into the g-MLP second layer (exact):
    #   [x_j | x_j @ aw1x + ab1] = gh @ [gw2 | gw2@aw1x] + [gb2 | gb2@aw1x + ab1]
    w_fold = jnp.concatenate([gw2, gw2 @ aw1x], axis=1)                 # (D, 2D)
    b_fold = jnp.concatenate([gb2, gb2 @ aw1x + ab1]).reshape(1, -1)    # (1, 2D)

    tn, n_pad = _row_tile(n, tile)
    feat = _pad_axis(feat.astype(jnp.bfloat16), n_pad, 1)               # (P, N_pad, 2D)
    mask = _pad_axis(mask.astype(jnp.float32), n_pad, 1)[..., None]     # (P, N_pad, 1)
    tgt = _pad_axis(tgt.astype(jnp.bfloat16), n_pad, 0)                 # (N_pad, D)

    weights = (gw1.astype(jnp.bfloat16), gb1.reshape(1, -1),
               w_fold, b_fold,
               aw1t.astype(jnp.bfloat16),
               aw2.reshape(1, -1), ab2.reshape(1, 1),
               agw, agb.reshape(1, -1))

    out = pl.pallas_call(
        _branch_kernel,
        out_shape=jax.ShapeDtypeStruct((n_pad, d), jnp.float32),
        grid=(n_pad // tn,),
        in_specs=[pl.BlockSpec((p, tn, d2), lambda i: (0, i, 0)),
                  pl.BlockSpec((p, tn, 1), lambda i: (0, i, 0)),
                  pl.BlockSpec((tn, d), lambda i: (i, 0))]
                 + [_wspec(w.shape) for w in weights],
        out_specs=pl.BlockSpec((tn, d), lambda i: (i, 0)),
        compiler_params=pltpu.CompilerParams(
            dimension_semantics=("parallel",), vmem_limit_bytes=VMEM_LIMIT),
    )(feat, mask, tgt, *weights)
    return out[:n]


def fused_attn_agg(x, sec, mask, attn_params, aggr_params, *, tile=TILE_N):
    """x, sec: (P, N, D) P-major, mask: (P, N) -> (N, D) f32."""
    p, n, d = x.shape
    aw1, ab1, aw2, ab2 = attn_params
    agw, agb = aggr_params

    tn, n_pad = _row_tile(n, tile)
    x = _pad_axis(x.astype(jnp.bfloat16), n_pad, 1)
    sec = _pad_axis(sec.astype(jnp.bfloat16), n_pad, 1)
    mask = _pad_axis(mask.astype(jnp.float32), n_pad, 1)[..., None]

    weights = (aw1[:d].astype(jnp.bfloat16), aw1[d:].astype(jnp.bfloat16),
               ab1.reshape(1, -1), aw2.reshape(1, -1), ab2.reshape(1, 1),
               agw, agb.reshape(1, -1))

    out = pl.pallas_call(
        _attn_agg_kernel,
        out_shape=jax.ShapeDtypeStruct((n_pad, d), jnp.float32),
        grid=(n_pad // tn,),
        in_specs=[pl.BlockSpec((p, tn, d), lambda i: (0, i, 0)),
                  pl.BlockSpec((p, tn, d), lambda i: (0, i, 0)),
                  pl.BlockSpec((p, tn, 1), lambda i: (0, i, 0))]
                 + [_wspec(w.shape) for w in weights],
        out_specs=pl.BlockSpec((tn, d), lambda i: (i, 0)),
        compiler_params=pltpu.CompilerParams(
            dimension_semantics=("parallel",), vmem_limit_bytes=VMEM_LIMIT),
    )(x, sec, mask, *weights)
    return out[:n]


def fused_head(h_ii, h_is, z_j, user_mlp, final_mlp, *, tile=TILE_N):
    """h_ii, h_is, z_j: (N, D) -> (N, 1)."""
    n, d = h_ii.shape
    (uw1, ub1), (uw2, ub2), (uw3, ub3) = user_mlp
    (fw1, fb1), (fw2, fb2), (fw3, fb3) = final_mlp

    tn, n_pad = _row_tile(n, tile)
    h_ii = _pad_axis(h_ii.astype(jnp.float32), n_pad, 0)
    h_is = _pad_axis(h_is.astype(jnp.float32), n_pad, 0)
    z_j = _pad_axis(z_j.astype(jnp.float32), n_pad, 0)

    weights = (uw1[:d], uw1[d:], ub1.reshape(1, -1), uw2, ub2.reshape(1, -1),
               uw3, ub3.reshape(1, -1),
               fw1[:d], fw1[d:], fb1.reshape(1, -1), fw2, fb2.reshape(1, -1),
               fw3.reshape(1, -1), fb3.reshape(1, -1))

    out = pl.pallas_call(
        _head_kernel,
        out_shape=jax.ShapeDtypeStruct((n_pad, 1), jnp.float32),
        grid=(n_pad // tn,),
        in_specs=[pl.BlockSpec((tn, d), lambda i: (i, 0))] * 3
                 + [_wspec(w.shape) for w in weights],
        out_specs=pl.BlockSpec((tn, 1), lambda i: (i, 0)),
        compiler_params=pltpu.CompilerParams(
            dimension_semantics=("parallel",), vmem_limit_bytes=VMEM_LIMIT),
    )(h_ii, h_is, z_j, *weights)
    return out[:n]


# --------------------------- parameter construction ------------------------- #

def init_linear(key, din, dout, scale=0.1):
    kw, kb = jax.random.split(key)
    w = jax.random.normal(kw, (din, dout), jnp.float32) * scale
    b = jax.random.normal(kb, (dout,), jnp.float32) * scale
    return w, b


def init_mlp(key, din, dout):
    # MLP class: Linear(din, din//2) -> ReLU -> Linear(din//2, dout)
    k1, k2 = jax.random.split(key)
    w1, b1 = init_linear(k1, din, din // 2)
    w2, b2 = init_linear(k2, din // 2, dout)
    return (w1, b1, w2, b2)


def init_params(key, n_users, n_items, n_ratings, D):
    keys = jax.random.split(key, 20)
    it = iter(keys)

    def emb(k, n):
        e = jax.random.normal(k, (n, D), jnp.float32) * 0.1
        return e.at[0].set(0.0)  # padding_idx=0

    return {
        "emb_dim": D,
        "user_emb": emb(next(it), n_users),
        "item_emb": emb(next(it), n_items),
        "rating_emb": emb(next(it), n_ratings),
        "user_model": {
            "g_v": init_mlp(next(it), 2 * D, D),
            "user_item_attn": init_mlp(next(it), 2 * D, 1),
            "aggr_items": init_linear(next(it), D, D),
            "user_user_attn": init_mlp(next(it), 2 * D, 1),
            "aggr_neighbors": init_linear(next(it), D, D),
            "mlp": [init_linear(next(it), 2 * D, D),
                    init_linear(next(it), D, D),
                    init_linear(next(it), D, D)],
        },
        "item_model": {
            "g_u": init_mlp(next(it), 2 * D, D),
            "item_users_attn": init_mlp(next(it), 2 * D, 1),
            "aggr_users": init_linear(next(it), D, D),
        },
        "mlp": [init_linear(next(it), 2 * D, D),
                init_linear(next(it), D, D),
                init_linear(next(it), D, 1)],
    }


# ---------------------------------- forward --------------------------------- #

def rec_forward(params, uids, iids, u_item_pad, u_user_pad, u_user_item_pad, i_user_pad):
    D = params["emb_dim"]
    um, im = params["user_model"], params["item_model"]
    # bf16 views of the (small) embedding tables so the gathered streams are bf16.
    user_bf = params["user_emb"].astype(jnp.bfloat16)
    item_bf = params["item_emb"].astype(jnp.bfloat16)
    rating_bf = params["rating_emb"].astype(jnp.bfloat16)

    B = uids.shape[0]
    P1 = u_item_pad.shape[1]
    P2 = u_user_pad.shape[1]
    P3 = u_user_item_pad.shape[2]

    # --- UserModel: user's own item history (P-major gathers, no HBM transpose) ---
    idx_ui = u_item_pad[:, :, 0].T                                   # (P1, B)
    feat_ui = jnp.concatenate(
        [item_bf[idx_ui], rating_bf[u_item_pad[:, :, 1].T]], axis=-1)  # (P1, B, 2D)
    mask_ui = (idx_ui > 0).astype(jnp.float32)
    tgt_u = user_bf[uids]                                            # (B, D)

    # --- UserModel: each neighbour's item history.  Rows are ordered p2-major so
    #     h_oI comes out already P-major for the social-attention kernel. ---
    idx_si = jnp.transpose(u_user_item_pad[:, :, :, 0], (2, 1, 0))   # (P3, P2, B)
    idx_sr = jnp.transpose(u_user_item_pad[:, :, :, 1], (2, 1, 0))
    vecs = jnp.concatenate([item_bf[idx_si], rating_bf[idx_sr]], axis=0)  # (2P3, P2, B, D)
    # Faithful to the torch code: cat(dim=2).view(-1, 2D) pairs consecutive D-slices.
    feat_s = jnp.concatenate([vecs[0::2], vecs[1::2]],
                             axis=-1).reshape(P3, P2 * B, 2 * D)
    mask_s = (idx_si > 0).astype(jnp.float32).reshape(P3, P2 * B)
    nb_pm = user_bf[u_user_pad.T]                                    # (P2, B, D)
    tgt_s = nb_pm.reshape(P2 * B, D)

    # --- ItemModel: item's user history ---
    idx_iu = i_user_pad[:, :, 0].T
    feat_iu = jnp.concatenate(
        [user_bf[idx_iu], rating_bf[i_user_pad[:, :, 1].T]], axis=-1)
    mask_iu = (idx_iu > 0).astype(jnp.float32)
    tgt_i = item_bf[iids]

    # --- the two g_v branches share all weights: merge into ONE pallas_call ---
    if P1 == P3:
        h_m = fused_branch(
            jnp.concatenate([feat_ui, feat_s], axis=1),
            jnp.concatenate([mask_ui, mask_s], axis=1),
            jnp.concatenate([tgt_u, tgt_s], axis=0),
            um["g_v"], um["user_item_attn"], um["aggr_items"])
        h_iI, h_oI = h_m[:B], h_m[B:]
    else:
        h_iI = fused_branch(feat_ui, mask_ui, tgt_u,
                            um["g_v"], um["user_item_attn"], um["aggr_items"])
        h_oI = fused_branch(feat_s, mask_s, tgt_s,
                            um["g_v"], um["user_item_attn"], um["aggr_items"])

    # --- ItemModel branch -> z_j (B, D) ---
    z_j = fused_branch(feat_iu, mask_iu, tgt_i,
                       im["g_u"], im["item_users_attn"], im["aggr_users"])

    # --- UserModel: social attention over neighbours -> h_iS (B, D) ---
    mask_su = (u_user_pad.T > 0).astype(jnp.float32)                 # (P2, B)
    h_iS = fused_attn_agg(h_oI.reshape(P2, B, D), nb_pm, mask_su,
                          um["user_user_attn"], um["aggr_neighbors"])

    # --- fused heads: UserModel.mlp + RecModule.mlp -> r_ij (B, 1) ---
    return fused_head(h_iI, h_iS, z_j, um["mlp"], params["mlp"])


# ----------------------------------- main ------------------------------------ #

if __name__ == "__main__":
    n_users, n_items, n_ratings, emb_dim = 10, 12, 6, 32
    B, P1, P2, P3, P4 = 2, 8, 4, 8, 8

    params = init_params(jax.random.PRNGKey(0), n_users, n_items, n_ratings, emb_dim)

    ks = jax.random.split(jax.random.PRNGKey(0), 9)
    uids = jax.random.randint(ks[0], (B,), 1, n_users)
    iids = jax.random.randint(ks[1], (B,), 1, n_items)
    u_item_pad = jnp.stack(
        [jax.random.randint(ks[2], (B, P1), 0, n_items),
         jax.random.randint(ks[3], (B, P1), 1, n_ratings)], axis=-1)
    u_user_pad = jax.random.randint(ks[4], (B, P2), 0, n_users)
    u_user_item_pad = jnp.stack(
        [jax.random.randint(ks[5], (B, P2, P3), 0, n_items),
         jax.random.randint(ks[6], (B, P2, P3), 1, n_ratings)], axis=-1)
    i_user_pad = jnp.stack(
        [jax.random.randint(ks[7], (B, P4), 0, n_users),
         jax.random.randint(ks[8], (B, P4), 1, n_ratings)], axis=-1)

    @jax.jit
    def run(uids, iids, u_item_pad, u_user_pad, u_user_item_pad, i_user_pad):
        return rec_forward(params, uids, iids, u_item_pad, u_user_pad,
                           u_user_item_pad, i_user_pad)

    out = jax.block_until_ready(
        run(uids, iids, u_item_pad, u_user_pad, u_user_item_pad, i_user_pad))
    assert out.shape == (B, 1) and out.dtype == jnp.float32
    print("KERNEL_OK")
</pallas_src>

<mosaic_0001>
module attributes {stable_mosaic.version = 11 : i64} {
  func.func @_branch_kernel(%arg0: i32, %arg1: memref<8x16x64xbf16, #tpu.memory_space<vmem>>, %arg2: memref<8x16x1xf32, #tpu.memory_space<vmem>>, %arg3: memref<16x32xbf16, #tpu.memory_space<vmem>>, %arg4: memref<64x32xbf16, #tpu.memory_space<vmem>>, %arg5: memref<1x32xf32, #tpu.memory_space<vmem>>, %arg6: memref<32x64xf32, #tpu.memory_space<vmem>>, %arg7: memref<1x64xf32, #tpu.memory_space<vmem>>, %arg8: memref<32x32xbf16, #tpu.memory_space<vmem>>, %arg9: memref<1x32xf32, #tpu.memory_space<vmem>>, %arg10: memref<1x1xf32, #tpu.memory_space<vmem>>, %arg11: memref<32x32xf32, #tpu.memory_space<vmem>>, %arg12: memref<1x32xf32, #tpu.memory_space<vmem>>, %arg13: memref<16x32xf32, #tpu.memory_space<vmem>>) attributes {dimension_semantics = [#tpu.dimension_semantics<parallel>], iteration_bounds = array<i64: 1>, scalar_prefetch = 0 : i64, scratch_operands = 0 : i64, tpu.core_type = #tpu.core_type<tc>, window_params = [{transform_indices = @transform_0, window_bounds = array<i64: 8, 16, 64>}, {transform_indices = @transform_1, window_bounds = array<i64: 8, 16, 1>}, {transform_indices = @transform_2, window_bounds = array<i64: 16, 32>}, {pipeline_mode = #tpu.pipeline_mode<synchronous>, transform_indices = @transform_3, window_bounds = array<i64: 64, 32>}, {pipeline_mode = #tpu.pipeline_mode<synchronous>, transform_indices = @transform_4, window_bounds = array<i64: 1, 32>}, {pipeline_mode = #tpu.pipeline_mode<synchronous>, transform_indices = @transform_5, window_bounds = array<i64: 32, 64>}, {pipeline_mode = #tpu.pipeline_mode<synchronous>, transform_indices = @transform_6, window_bounds = array<i64: 1, 64>}, {pipeline_mode = #tpu.pipeline_mode<synchronous>, transform_indices = @transform_7, window_bounds = array<i64: 32, 32>}, {pipeline_mode = #tpu.pipeline_mode<synchronous>, transform_indices = @transform_8, window_bounds = array<i64: 1, 32>}, {pipeline_mode = #tpu.pipeline_mode<synchronous>, transform_indices = @transform_9, window_bounds = array<i64: 1, 1>}, {pipeline_mode = #tpu.pipeline_mode<synchronous>, transform_indices = @transform_10, window_bounds = array<i64: 32, 32>}, {pipeline_mode = #tpu.pipeline_mode<synchronous>, transform_indices = @transform_11, window_bounds = array<i64: 1, 32>}, {transform_indices = @transform_12, window_bounds = array<i64: 16, 32>}]} {
    %c0 = arith.constant 0 : index
    %c0_0 = arith.constant 0 : index
    %c0_1 = arith.constant 0 : index
    %0 = vector.load %arg1[%c0, %c0_0, %c0_1] : memref<8x16x64xbf16, #tpu.memory_space<vmem>>, vector<8x16x64xbf16>
    %1 = vector.shape_cast %0 : vector<8x16x64xbf16> to vector<128x64xbf16>
    %c0_2 = arith.constant 0 : index
    %c0_3 = arith.constant 0 : index
    %2 = vector.load %arg4[%c0_2, %c0_3] : memref<64x32xbf16, #tpu.memory_space<vmem>>, vector<64x32xbf16>
    %cst = arith.constant dense<0.000000e+00> : vector<128x32xf32>
    %3 = tpu.matmul %1, %2, %cst {dimension_numbers = #tpu.dot_dimension_numbers<[1], [0], [0], [1], [0, 0, 1, 1], [], []>} : vector<128x64xbf16>, vector<64x32xbf16>, vector<128x32xf32> -> vector<128x32xf32>
    %c0_4 = arith.constant 0 : index
    %c0_5 = arith.constant 0 : index
    %4 = vector.load %arg5[%c0_4, %c0_5] : memref<1x32xf32, #tpu.memory_space<vmem>>, vector<1x32xf32>
    %5 = vector.broadcast %4 : vector<1x32xf32> to vector<128x32xf32>
    %6 = arith.addf %3, %5 : vector<128x32xf32>
    %cst_6 = arith.constant 0.000000e+00 : f32
    %7 = vector.broadcast %cst_6 : f32 to vector<128x32xf32>
    %8 = arith.maximumf %6, %7 : vector<128x32xf32>
    %c0_7 = arith.constant 0 : index
    %c0_8 = arith.constant 0 : index
    %9 = vector.load %arg6[%c0_7, %c0_8] : memref<32x64xf32, #tpu.memory_space<vmem>>, vector<32x64xf32>
    %cst_9 = arith.constant dense<0.000000e+00> : vector<128x64xf32>
    %10 = tpu.matmul %8, %9, %cst_9 {dimension_numbers = #tpu.dot_dimension_numbers<[1], [0], [0], [1], [0, 0, 1, 1], [], []>} : vector<128x32xf32>, vector<32x64xf32>, vector<128x64xf32> -> vector<128x64xf32>
    %c0_10 = arith.constant 0 : index
    %c0_11 = arith.constant 0 : index
    %11 = vector.load %arg7[%c0_10, %c0_11] : memref<1x64xf32, #tpu.memory_space<vmem>>, vector<1x64xf32>
    %12 = vector.broadcast %11 : vector<1x64xf32> to vector<128x64xf32>
    %13 = arith.addf %10, %12 : vector<128x64xf32>
    %14 = vector.extract_strided_slice %13 {offsets = [0, 0], sizes = [128, 32], strides = [1, 1]} : vector<128x64xf32> to vector<128x32xf32>
    %15 = vector.shape_cast %14 : vector<128x32xf32> to vector<8x16x32xf32>
    %16 = vector.extract_strided_slice %13 {offsets = [0, 32], sizes = [128, 32], strides = [1, 1]} : vector<128x64xf32> to vector<128x32xf32>
    %17 = vector.shape_cast %16 : vector<128x32xf32> to vector<8x16x32xf32>
    %c0_12 = arith.constant 0 : index
    %c0_13 = arith.constant 0 : index
    %c0_14 = arith.constant 0 : index
    %18 = vector.load %arg2[%c0_12, %c0_13, %c0_14] : memref<8x16x1xf32, #tpu.memory_space<vmem>>, vector<8x16x1xf32>
    %c0_15 = arith.constant 0 : index
    %c0_16 = arith.constant 0 : index
    %19 = vector.load %arg3[%c0_15, %c0_16] : memref<16x32xbf16, #tpu.memory_space<vmem>>, vector<16x32xbf16>
    %c0_17 = arith.constant 0 : index
    %c0_18 = arith.constant 0 : index
    %20 = vector.load %arg8[%c0_17, %c0_18] : memref<32x32xbf16, #tpu.memory_space<vmem>>, vector<32x32xbf16>
    %cst_19 = arith.constant dense<0.000000e+00> : vector<16x32xf32>
    %21 = tpu.matmul %19, %20, %cst_19 {dimension_numbers = #tpu.dot_dimension_numbers<[1], [0], [0], [1], [0, 0, 1, 1], [], []>} : vector<16x32xbf16>, vector<32x32xbf16>, vector<16x32xf32> -> vector<16x32xf32>
    %22 = vector.shape_cast %21 : vector<16x32xf32> to vector<1x16x32xf32>
    %23 = vector.broadcast %18 : vector<8x16x1xf32> to vector<8x16x32xf32>
    %24 = vector.broadcast %22 : vector<1x16x32xf32> to vector<8x16x32xf32>
    %25 = arith.mulf %23, %24 : vector<8x16x32xf32>
    %26 = arith.addf %17, %25 : vector<8x16x32xf32>
    %cst_20 = arith.constant 0.000000e+00 : f32
    %27 = vector.broadcast %cst_20 : f32 to vector<8x16x32xf32>
    %28 = arith.maximumf %26, %27 : vector<8x16x32xf32>
    %c0_21 = arith.constant 0 : index
    %c0_22 = arith.constant 0 : index
    %29 = vector.load %arg9[%c0_21, %c0_22] : memref<1x32xf32, #tpu.memory_space<vmem>>, vector<1x32xf32>
    %30 = vector.shape_cast %29 : vector<1x32xf32> to vector<1x1x32xf32>
    %31 = vector.broadcast %30 : vector<1x1x32xf32> to vector<8x16x32xf32>
    %32 = arith.mulf %28, %31 : vector<8x16x32xf32>
    %cst_23 = arith.constant dense<0.000000e+00> : vector<8x16xf32>
    %33 = vector.multi_reduction <add>, %32, %cst_23 [2] : vector<8x16x32xf32> to vector<8x16xf32>
    %34 = vector.shape_cast %33 : vector<8x16xf32> to vector<8x16x1xf32>
    %c0_24 = arith.constant 0 : index
    %c0_25 = arith.constant 0 : index
    %35 = vector.load %arg10[%c0_24, %c0_25] : memref<1x1xf32, #tpu.memory_space<vmem>>, vector<1x1xf32>
    %36 = vector.shape_cast %35 : vector<1x1xf32> to vector<1x1x1xf32>
    %37 = vector.broadcast %36 : vector<1x1x1xf32> to vector<8x16x1xf32>
    %38 = arith.addf %34, %37 : vector<8x16x1xf32>
    %39 = math.exp %38 : vector<8x16x1xf32>
    %40 = arith.mulf %39, %18 : vector<8x16x1xf32>
    %41 = vector.broadcast %40 : vector<8x16x1xf32> to vector<8x16x32xf32>
    %42 = arith.mulf %41, %15 : vector<8x16x32xf32>
    %cst_26 = arith.constant dense<0.000000e+00> : vector<16x32xf32>
    %43 = vector.multi_reduction <add>, %42, %cst_26 [0] : vector<8x16x32xf32> to vector<16x32xf32>
    %cst_27 = arith.constant dense<0.000000e+00> : vector<16x1xf32>
    %44 = vector.multi_reduction <add>, %40, %cst_27 [0] : vector<8x16x1xf32> to vector<16x1xf32>
    %cst_28 = arith.constant 1.000000e-10 : f32
    %45 = vector.broadcast %cst_28 : f32 to vector<16x1xf32>
    %46 = arith.addf %44, %45 : vector<16x1xf32>
    %47 = tpu.reciprocal %46 {approx = true} : vector<16x1xf32> -> vector<16x1xf32>
    %48 = vector.broadcast %47 : vector<16x1xf32> to vector<16x32xf32>
    %49 = arith.mulf %43, %48 : vector<16x32xf32>
    %c0_29 = arith.constant 0 : index
    %c0_30 = arith.constant 0 : index
    %50 = vector.load %arg11[%c0_29, %c0_30] : memref<32x32xf32, #tpu.memory_space<vmem>>, vector<32x32xf32>
    %cst_31 = arith.constant dense<0.000000e+00> : vector<16x32xf32>
    %51 = tpu.matmul %49, %50, %cst_31 {dimension_numbers = #tpu.dot_dimension_numbers<[1], [0], [0], [1], [0, 0, 1, 1], [], []>} : vector<16x32xf32>, vector<32x32xf32>, vector<16x32xf32> -> vector<16x32xf32>
    %c0_32 = arith.constant 0 : index
    %c0_33 = arith.constant 0 : index
    %52 = vector.load %arg12[%c0_32, %c0_33] : memref<1x32xf32, #tpu.memory_space<vmem>>, vector<1x32xf32>
    %53 = vector.broadcast %52 : vector<1x32xf32> to vector<16x32xf32>
    %54 = arith.addf %51, %53 : vector<16x32xf32>
    %cst_34 = arith.constant 0.000000e+00 : f32
    %55 = vector.broadcast %cst_34 : f32 to vector<16x32xf32>
    %56 = arith.maximumf %54, %55 : vector<16x32xf32>
    %c0_35 = arith.constant 0 : index
    %c0_36 = arith.constant 0 : index
    %57 = vector.load %arg13[%c0_35, %c0_36] : memref<16x32xf32, #tpu.memory_space<vmem>>, vector<16x32xf32>
    tpu.vector_store %arg13[%c0_35, %c0_36], %56 {strides = array<i32>} : memref<16x32xf32, #tpu.memory_space<vmem>>, vector<16x32xf32>,
    return
  }
  func.func @transform_0(%arg0: i32) -> (i32, i32, i32) {
    %c0_i32 = arith.constant 0 : i32
    %c0_i32_0 = arith.constant 0 : i32
    %c0_i32_1 = arith.constant 0 : i32
    return %c0_i32, %arg0, %c0_i32_0 : i32, i32, i32
  }
  func.func @transform_1(%arg0: i32) -> (i32, i32, i32) {
    %c0_i32 = arith.constant 0 : i32
    %c0_i32_0 = arith.constant 0 : i32
    %c0_i32_1 = arith.constant 0 : i32
    return %c0_i32, %arg0, %c0_i32_0 : i32, i32, i32
  }
  func.func @transform_2(%arg0: i32) -> (i32, i32) {
    %c0_i32 = arith.constant 0 : i32
    %c0_i32_0 = arith.constant 0 : i32
    return %arg0, %c0_i32 : i32, i32
  }
  func.func @transform_3(%arg0: i32) -> (i32, i32) {
    %c0_i32 = arith.constant 0 : i32
    %c0_i32_0 = arith.constant 0 : i32
    %c0_i32_1 = arith.constant 0 : i32
    return %c0_i32, %c0_i32_0 : i32, i32
  }
  func.func @transform_4(%arg0: i32) -> (i32, i32) {
    %c0_i32 = arith.constant 0 : i32
    %c0_i32_0 = arith.constant 0 : i32
    %c0_i32_1 = arith.constant 0 : i32
    return %c0_i32, %c0_i32_0 : i32, i32
  }
  func.func @transform_5(%arg0: i32) -> (i32, i32) {
    %c0_i32 = arith.constant 0 : i32
    %c0_i32_0 = arith.constant 0 : i32
    %c0_i32_1 = arith.constant 0 : i32
    return %c0_i32, %c0_i32_0 : i32, i32
  }
  func.func @transform_6(%arg0: i32) -> (i32, i32) {
    %c0_i32 = arith.constant 0 : i32
    %c0_i32_0 = arith.constant 0 : i32
    %c0_i32_1 = arith.constant 0 : i32
    return %c0_i32, %c0_i32_0 : i32, i32
  }
  func.func @transform_7(%arg0: i32) -> (i32, i32) {
    %c0_i32 = arith.constant 0 : i32
    %c0_i32_0 = arith.constant 0 : i32
    %c0_i32_1 = arith.constant 0 : i32
    return %c0_i32, %c0_i32_0 : i32, i32
  }
  func.func @transform_8(%arg0: i32) -> (i32, i32) {
    %c0_i32 = arith.constant 0 : i32
    %c0_i32_0 = arith.constant 0 : i32
    %c0_i32_1 = arith.constant 0 : i32
    return %c0_i32, %c0_i32_0 : i32, i32
  }
  func.func @transform_9(%arg0: i32) -> (i32, i32) {
    %c0_i32 = arith.constant 0 : i32
    %c0_i32_0 = arith.constant 0 : i32
    %c0_i32_1 = arith.constant 0 : i32
    return %c0_i32, %c0_i32_0 : i32, i32
  }
  func.func @transform_10(%arg0: i32) -> (i32, i32) {
    %c0_i32 = arith.constant 0 : i32
    %c0_i32_0 = arith.constant 0 : i32
    %c0_i32_1 = arith.constant 0 : i32
    return %c0_i32, %c0_i32_0 : i32, i32
  }
  func.func @transform_11(%arg0: i32) -> (i32, i32) {
    %c0_i32 = arith.constant 0 : i32
    %c0_i32_0 = arith.constant 0 : i32
    %c0_i32_1 = arith.constant 0 : i32
    return %c0_i32, %c0_i32_0 : i32, i32
  }
  func.func @transform_12(%arg0: i32) -> (i32, i32) {
    %c0_i32 = arith.constant 0 : i32
    %c0_i32_0 = arith.constant 0 : i32
    return %arg0, %c0_i32 : i32, i32
  }
}

module attributes {stable_mosaic.version = 11 : i64} {
  func.func @_attn_agg_kernel(%arg0: i32, %arg1: memref<4x16x32xbf16, #tpu.memory_space<vmem>>, %arg2: memref<4x16x32xbf16, #tpu.memory_space<vmem>>, %arg3: memref<4x16x1xf32, #tpu.memory_space<vmem>>, %arg4: memref<32x32xbf16, #tpu.memory_space<vmem>>, %arg5: memref<32x32xbf16, #tpu.memory_space<vmem>>, %arg6: memref<1x32xf32, #tpu.memory_space<vmem>>, %arg7: memref<1x32xf32, #tpu.memory_space<vmem>>, %arg8: memref<1x1xf32, #tpu.memory_space<vmem>>, %arg9: memref<32x32xf32, #tpu.memory_space<vmem>>, %arg10: memref<1x32xf32, #tpu.memory_space<vmem>>, %arg11: memref<16x32xf32, #tpu.memory_space<vmem>>) attributes {dimension_semantics = [#tpu.dimension_semantics<parallel>], iteration_bounds = array<i64: 1>, scalar_prefetch = 0 : i64, scratch_operands = 0 : i64, tpu.core_type = #tpu.core_type<tc>, window_params = [{transform_indices = @transform_0, window_bounds = array<i64: 4, 16, 32>}, {transform_indices = @transform_1, window_bounds = array<i64: 4, 16, 32>}, {transform_indices = @transform_2, window_bounds = array<i64: 4, 16, 1>}, {pipeline_mode = #tpu.pipeline_mode<synchronous>, transform_indices = @transform_3, window_bounds = array<i64: 32, 32>}, {pipeline_mode = #tpu.pipeline_mode<synchronous>, transform_indices = @transform_4, window_bounds = array<i64: 32, 32>}, {pipeline_mode = #tpu.pipeline_mode<synchronous>, transform_indices = @transform_5, window_bounds = array<i64: 1, 32>}, {pipeline_mode = #tpu.pipeline_mode<synchronous>, transform_indices = @transform_6, window_bounds = array<i64: 1, 32>}, {pipeline_mode = #tpu.pipeline_mode<synchronous>, transform_indices = @transform_7, window_bounds = array<i64: 1, 1>}, {pipeline_mode = #tpu.pipeline_mode<synchronous>, transform_indices = @transform_8, window_bounds = array<i64: 32, 32>}, {pipeline_mode = #tpu.pipeline_mode<synchronous>, transform_indices = @transform_9, window_bounds = array<i64: 1, 32>}, {transform_indices = @transform_10, window_bounds = array<i64: 16, 32>}]} {
    %c0 = arith.constant 0 : index
    %c0_0 = arith.constant 0 : index
    %c0_1 = arith.constant 0 : index
    %0 = vector.load %arg1[%c0, %c0_0, %c0_1] : memref<4x16x32xbf16, #tpu.memory_space<vmem>>, vector<4x16x32xbf16>
    %1 = vector.shape_cast %0 : vector<4x16x32xbf16> to vector<64x32xbf16>
    %c0_2 = arith.constant 0 : index
    %c0_3 = arith.constant 0 : index
    %c0_4 = arith.constant 0 : index
    %2 = vector.load %arg2[%c0_2, %c0_3, %c0_4] : memref<4x16x32xbf16, #tpu.memory_space<vmem>>, vector<4x16x32xbf16>
    %3 = vector.shape_cast %2 : vector<4x16x32xbf16> to vector<64x32xbf16>
    %c0_5 = arith.constant 0 : index
    %c0_6 = arith.constant 0 : index
    %4 = vector.load %arg4[%c0_5, %c0_6] : memref<32x32xbf16, #tpu.memory_space<vmem>>, vector<32x32xbf16>
    %cst = arith.constant dense<0.000000e+00> : vector<64x32xf32>
    %5 = tpu.matmul %1, %4, %cst {dimension_numbers = #tpu.dot_dimension_numbers<[1], [0], [0], [1], [0, 0, 1, 1], [], []>} : vector<64x32xbf16>, vector<32x32xbf16>, vector<64x32xf32> -> vector<64x32xf32>
    %c0_7 = arith.constant 0 : index
    %c0_8 = arith.constant 0 : index
    %6 = vector.load %arg5[%c0_7, %c0_8] : memref<32x32xbf16, #tpu.memory_space<vmem>>, vector<32x32xbf16>
    %cst_9 = arith.constant dense<0.000000e+00> : vector<64x32xf32>
    %7 = tpu.matmul %3, %6, %cst_9 {dimension_numbers = #tpu.dot_dimension_numbers<[1], [0], [0], [1], [0, 0, 1, 1], [], []>} : vector<64x32xbf16>, vector<32x32xbf16>, vector<64x32xf32> -> vector<64x32xf32>
    %8 = arith.addf %5, %7 : vector<64x32xf32>
    %c0_10 = arith.constant 0 : index
    %c0_11 = arith.constant 0 : index
    %9 = vector.load %arg6[%c0_10, %c0_11] : memref<1x32xf32, #tpu.memory_space<vmem>>, vector<1x32xf32>
    %10 = vector.broadcast %9 : vector<1x32xf32> to vector<64x32xf32>
    %11 = arith.addf %8, %10 : vector<64x32xf32>
    %cst_12 = arith.constant 0.000000e+00 : f32
    %12 = vector.broadcast %cst_12 : f32 to vector<64x32xf32>
    %13 = arith.maximumf %11, %12 : vector<64x32xf32>
    %14 = vector.shape_cast %13 : vector<64x32xf32> to vector<4x16x32xf32>
    %c0_13 = arith.constant 0 : index
    %c0_14 = arith.constant 0 : index
    %15 = vector.load %arg7[%c0_13, %c0_14] : memref<1x32xf32, #tpu.memory_space<vmem>>, vector<1x32xf32>
    %16 = vector.shape_cast %15 : vector<1x32xf32> to vector<1x1x32xf32>
    %17 = vector.broadcast %16 : vector<1x1x32xf32> to vector<4x16x32xf32>
    %18 = arith.mulf %14, %17 : vector<4x16x32xf32>
    %cst_15 = arith.constant dense<0.000000e+00> : vector<4x16xf32>
    %19 = vector.multi_reduction <add>, %18, %cst_15 [2] : vector<4x16x32xf32> to vector<4x16xf32>
    %20 = vector.shape_cast %19 : vector<4x16xf32> to vector<4x16x1xf32>
    %c0_16 = arith.constant 0 : index
    %c0_17 = arith.constant 0 : index
    %21 = vector.load %arg8[%c0_16, %c0_17] : memref<1x1xf32, #tpu.memory_space<vmem>>, vector<1x1xf32>
    %22 = vector.shape_cast %21 : vector<1x1xf32> to vector<1x1x1xf32>
    %23 = vector.broadcast %22 : vector<1x1x1xf32> to vector<4x16x1xf32>
    %24 = arith.addf %20, %23 : vector<4x16x1xf32>
    %c0_18 = arith.constant 0 : index
    %c0_19 = arith.constant 0 : index
    %c0_20 = arith.constant 0 : index
    %25 = vector.load %arg3[%c0_18, %c0_19, %c0_20] : memref<4x16x1xf32, #tpu.memory_space<vmem>>, vector<4x16x1xf32>
    %26 = math.exp %24 : vector<4x16x1xf32>
    %27 = arith.mulf %26, %25 : vector<4x16x1xf32>
    %c0_21 = arith.constant 0 : index
    %c0_22 = arith.constant 0 : index
    %c0_23 = arith.constant 0 : index
    %28 = vector.load %arg1[%c0_21, %c0_22, %c0_23] : memref<4x16x32xbf16, #tpu.memory_space<vmem>>, vector<4x16x32xbf16>
    %29 = arith.extf %28 : vector<4x16x32xbf16> to vector<4x16x32xf32>
    %30 = vector.broadcast %27 : vector<4x16x1xf32> to vector<4x16x32xf32>
    %31 = arith.mulf %30, %29 : vector<4x16x32xf32>
    %cst_24 = arith.constant dense<0.000000e+00> : vector<16x32xf32>
    %32 = vector.multi_reduction <add>, %31, %cst_24 [0] : vector<4x16x32xf32> to vector<16x32xf32>
    %cst_25 = arith.constant dense<0.000000e+00> : vector<16x1xf32>
    %33 = vector.multi_reduction <add>, %27, %cst_25 [0] : vector<4x16x1xf32> to vector<16x1xf32>
    %cst_26 = arith.constant 1.000000e-10 : f32
    %34 = vector.broadcast %cst_26 : f32 to vector<16x1xf32>
    %35 = arith.addf %33, %34 : vector<16x1xf32>
    %36 = tpu.reciprocal %35 {approx = true} : vector<16x1xf32> -> vector<16x1xf32>
    %37 = vector.broadcast %36 : vector<16x1xf32> to vector<16x32xf32>
    %38 = arith.mulf %32, %37 : vector<16x32xf32>
    %c0_27 = arith.constant 0 : index
    %c0_28 = arith.constant 0 : index
    %39 = vector.load %arg9[%c0_27, %c0_28] : memref<32x32xf32, #tpu.memory_space<vmem>>, vector<32x32xf32>
    %cst_29 = arith.constant dense<0.000000e+00> : vector<16x32xf32>
    %40 = tpu.matmul %38, %39, %cst_29 {dimension_numbers = #tpu.dot_dimension_numbers<[1], [0], [0], [1], [0, 0, 1, 1], [], []>} : vector<16x32xf32>, vector<32x32xf32>, vector<16x32xf32> -> vector<16x32xf32>
    %c0_30 = arith.constant 0 : index
    %c0_31 = arith.constant 0 : index
    %41 = vector.load %arg10[%c0_30, %c0_31] : memref<1x32xf32, #tpu.memory_space<vmem>>, vector<1x32xf32>
    %42 = vector.broadcast %41 : vector<1x32xf32> to vector<16x32xf32>
    %43 = arith.addf %40, %42 : vector<16x32xf32>
    %cst_32 = arith.constant 0.000000e+00 : f32
    %44 = vector.broadcast %cst_32 : f32 to vector<16x32xf32>
    %45 = arith.maximumf %43, %44 : vector<16x32xf32>
    %c0_33 = arith.constant 0 : index
    %c0_34 = arith.constant 0 : index
    %46 = vector.load %arg11[%c0_33, %c0_34] : memref<16x32xf32, #tpu.memory_space<vmem>>, vector<16x32xf32>
    tpu.vector_store %arg11[%c0_33, %c0_34], %45 {strides = array<i32>} : memref<16x32xf32, #tpu.memory_space<vmem>>, vector<16x32xf32>,
    return
  }
  func.func @transform_0(%arg0: i32) -> (i32, i32, i32) {
    %c0_i32 = arith.constant 0 : i32
    %c0_i32_0 = arith.constant 0 : i32
    %c0_i32_1 = arith.constant 0 : i32
    return %c0_i32, %arg0, %c0_i32_0 : i32, i32, i32
  }
  func.func @transform_1(%arg0: i32) -> (i32, i32, i32) {
    %c0_i32 = arith.constant 0 : i32
    %c0_i32_0 = arith.constant 0 : i32
    %c0_i32_1 = arith.constant 0 : i32
    return %c0_i32, %arg0, %c0_i32_0 : i32, i32, i32
  }
  func.func @transform_2(%arg0: i32) -> (i32, i32, i32) {
    %c0_i32 = arith.constant 0 : i32
    %c0_i32_0 = arith.constant 0 : i32
    %c0_i32_1 = arith.constant 0 : i32
    return %c0_i32, %arg0, %c0_i32_0 : i32, i32, i32
  }
  func.func @transform_3(%arg0: i32) -> (i32, i32) {
    %c0_i32 = arith.constant 0 : i32
    %c0_i32_0 = arith.constant 0 : i32
    %c0_i32_1 = arith.constant 0 : i32
    return %c0_i32, %c0_i32_0 : i32, i32
  }
  func.func @transform_4(%arg0: i32) -> (i32, i32) {
    %c0_i32 = arith.constant 0 : i32
    %c0_i32_0 = arith.constant 0 : i32
    %c0_i32_1 = arith.constant 0 : i32
    return %c0_i32, %c0_i32_0 : i32, i32
  }
  func.func @transform_5(%arg0: i32) -> (i32, i32) {
    %c0_i32 = arith.constant 0 : i32
    %c0_i32_0 = arith.constant 0 : i32
    %c0_i32_1 = arith.constant 0 : i32
    return %c0_i32, %c0_i32_0 : i32, i32
  }
  func.func @transform_6(%arg0: i32) -> (i32, i32) {
    %c0_i32 = arith.constant 0 : i32
    %c0_i32_0 = arith.constant 0 : i32
    %c0_i32_1 = arith.constant 0 : i32
    return %c0_i32, %c0_i32_0 : i32, i32
  }
  func.func @transform_7(%arg0: i32) -> (i32, i32) {
    %c0_i32 = arith.constant 0 : i32
    %c0_i32_0 = arith.constant 0 : i32
    %c0_i32_1 = arith.constant 0 : i32
    return %c0_i32, %c0_i32_0 : i32, i32
  }
  func.func @transform_8(%arg0: i32) -> (i32, i32) {
    %c0_i32 = arith.constant 0 : i32
    %c0_i32_0 = arith.constant 0 : i32
    %c0_i32_1 = arith.constant 0 : i32
    return %c0_i32, %c0_i32_0 : i32, i32
  }
  func.func @transform_9(%arg0: i32) -> (i32, i32) {
    %c0_i32 = arith.constant 0 : i32
    %c0_i32_0 = arith.constant 0 : i32
    %c0_i32_1 = arith.constant 0 : i32
    return %c0_i32, %c0_i32_0 : i32, i32
  }
  func.func @transform_10(%arg0: i32) -> (i32, i32) {
    %c0_i32 = arith.constant 0 : i32
    %c0_i32_0 = arith.constant 0 : i32
    return %arg0, %c0_i32 : i32, i32
  }
}

module attributes {stable_mosaic.version = 11 : i64} {
  func.func @_head_kernel(%arg0: i32, %arg1: memref<16x32xf32, #tpu.memory_space<vmem>>, %arg2: memref<16x32xf32, #tpu.memory_space<vmem>>, %arg3: memref<16x32xf32, #tpu.memory_space<vmem>>, %arg4: memref<32x32xf32, #tpu.memory_space<vmem>>, %arg5: memref<32x32xf32, #tpu.memory_space<vmem>>, %arg6: memref<1x32xf32, #tpu.memory_space<vmem>>, %arg7: memref<32x32xf32, #tpu.memory_space<vmem>>, %arg8: memref<1x32xf32, #tpu.memory_space<vmem>>, %arg9: memref<32x32xf32, #tpu.memory_space<vmem>>, %arg10: memref<1x32xf32, #tpu.memory_space<vmem>>, %arg11: memref<32x32xf32, #tpu.memory_space<vmem>>, %arg12: memref<32x32xf32, #tpu.memory_space<vmem>>, %arg13: memref<1x32xf32, #tpu.memory_space<vmem>>, %arg14: memref<32x32xf32, #tpu.memory_space<vmem>>, %arg15: memref<1x32xf32, #tpu.memory_space<vmem>>, %arg16: memref<1x32xf32, #tpu.memory_space<vmem>>, %arg17: memref<1x1xf32, #tpu.memory_space<vmem>>, %arg18: memref<16x1xf32, #tpu.memory_space<vmem>>) attributes {dimension_semantics = [#tpu.dimension_semantics<parallel>], iteration_bounds = array<i64: 1>, scalar_prefetch = 0 : i64, scratch_operands = 0 : i64, tpu.core_type = #tpu.core_type<tc>, window_params = [{transform_indices = @transform_0, window_bounds = array<i64: 16, 32>}, {transform_indices = @transform_1, window_bounds = array<i64: 16, 32>}, {transform_indices = @transform_2, window_bounds = array<i64: 16, 32>}, {pipeline_mode = #tpu.pipeline_mode<synchronous>, transform_indices = @transform_3, window_bounds = array<i64: 32, 32>}, {pipeline_mode = #tpu.pipeline_mode<synchronous>, transform_indices = @transform_4, window_bounds = array<i64: 32, 32>}, {pipeline_mode = #tpu.pipeline_mode<synchronous>, transform_indices = @transform_5, window_bounds = array<i64: 1, 32>}, {pipeline_mode = #tpu.pipeline_mode<synchronous>, transform_indices = @transform_6, window_bounds = array<i64: 32, 32>}, {pipeline_mode = #tpu.pipeline_mode<synchronous>, transform_indices = @transform_7, window_bounds = array<i64: 1, 32>}, {pipeline_mode = #tpu.pipeline_mode<synchronous>, transform_indices = @transform_8, window_bounds = array<i64: 32, 32>}, {pipeline_mode = #tpu.pipeline_mode<synchronous>, transform_indices = @transform_9, window_bounds = array<i64: 1, 32>}, {pipeline_mode = #tpu.pipeline_mode<synchronous>, transform_indices = @transform_10, window_bounds = array<i64: 32, 32>}, {pipeline_mode = #tpu.pipeline_mode<synchronous>, transform_indices = @transform_11, window_bounds = array<i64: 32, 32>}, {pipeline_mode = #tpu.pipeline_mode<synchronous>, transform_indices = @transform_12, window_bounds = array<i64: 1, 32>}, {pipeline_mode = #tpu.pipeline_mode<synchronous>, transform_indices = @transform_13, window_bounds = array<i64: 32, 32>}, {pipeline_mode = #tpu.pipeline_mode<synchronous>, transform_indices = @transform_14, window_bounds = array<i64: 1, 32>}, {pipeline_mode = #tpu.pipeline_mode<synchronous>, transform_indices = @transform_15, window_bounds = array<i64: 1, 32>}, {pipeline_mode = #tpu.pipeline_mode<synchronous>, transform_indices = @transform_16, window_bounds = array<i64: 1, 1>}, {transform_indices = @transform_17, window_bounds = array<i64: 16, 1>}]} {
    %c0 = arith.constant 0 : index
    %c0_0 = arith.constant 0 : index
    %0 = vector.load %arg1[%c0, %c0_0] : memref<16x32xf32, #tpu.memory_space<vmem>>, vector<16x32xf32>
    %c0_1 = arith.constant 0 : index
    %c0_2 = arith.constant 0 : index
    %1 = vector.load %arg4[%c0_1, %c0_2] : memref<32x32xf32, #tpu.memory_space<vmem>>, vector<32x32xf32>
    %cst = arith.constant dense<0.000000e+00> : vector<16x32xf32>
    %2 = tpu.matmul %0, %1, %cst {dimension_numbers = #tpu.dot_dimension_numbers<[1], [0], [0], [1], [0, 0, 1, 1], [], []>} : vector<16x32xf32>, vector<32x32xf32>, vector<16x32xf32> -> vector<16x32xf32>
    %c0_3 = arith.constant 0 : index
    %c0_4 = arith.constant 0 : index
    %3 = vector.load %arg2[%c0_3, %c0_4] : memref<16x32xf32, #tpu.memory_space<vmem>>, vector<16x32xf32>
    %c0_5 = arith.constant 0 : index
    %c0_6 = arith.constant 0 : index
    %4 = vector.load %arg5[%c0_5, %c0_6] : memref<32x32xf32, #tpu.memory_space<vmem>>, vector<32x32xf32>
    %cst_7 = arith.constant dense<0.000000e+00> : vector<16x32xf32>
    %5 = tpu.matmul %3, %4, %cst_7 {dimension_numbers = #tpu.dot_dimension_numbers<[1], [0], [0], [1], [0, 0, 1, 1], [], []>} : vector<16x32xf32>, vector<32x32xf32>, vector<16x32xf32> -> vector<16x32xf32>
    %6 = arith.addf %2, %5 : vector<16x32xf32>
    %c0_8 = arith.constant 0 : index
    %c0_9 = arith.constant 0 : index
    %7 = vector.load %arg6[%c0_8, %c0_9] : memref<1x32xf32, #tpu.memory_space<vmem>>, vector<1x32xf32>
    %8 = vector.broadcast %7 : vector<1x32xf32> to vector<16x32xf32>
    %9 = arith.addf %6, %8 : vector<16x32xf32>
    %cst_10 = arith.constant 0.000000e+00 : f32
    %10 = vector.broadcast %cst_10 : f32 to vector<16x32xf32>
    %11 = arith.maximumf %9, %10 : vector<16x32xf32>
    %c0_11 = arith.constant 0 : index
    %c0_12 = arith.constant 0 : index
    %12 = vector.load %arg7[%c0_11, %c0_12] : memref<32x32xf32, #tpu.memory_space<vmem>>, vector<32x32xf32>
    %cst_13 = arith.constant dense<0.000000e+00> : vector<16x32xf32>
    %13 = tpu.matmul %11, %12, %cst_13 {dimension_numbers = #tpu.dot_dimension_numbers<[1], [0], [0], [1], [0, 0, 1, 1], [], []>} : vector<16x32xf32>, vector<32x32xf32>, vector<16x32xf32> -> vector<16x32xf32>
    %c0_14 = arith.constant 0 : index
    %c0_15 = arith.constant 0 : index
    %14 = vector.load %arg8[%c0_14, %c0_15] : memref<1x32xf32, #tpu.memory_space<vmem>>, vector<1x32xf32>
    %15 = vector.broadcast %14 : vector<1x32xf32> to vector<16x32xf32>
    %16 = arith.addf %13, %15 : vector<16x32xf32>
    %cst_16 = arith.constant 0.000000e+00 : f32
    %17 = vector.broadcast %cst_16 : f32 to vector<16x32xf32>
    %18 = arith.maximumf %16, %17 : vector<16x32xf32>
    %c0_17 = arith.constant 0 : index
    %c0_18 = arith.constant 0 : index
    %19 = vector.load %arg9[%c0_17, %c0_18] : memref<32x32xf32, #tpu.memory_space<vmem>>, vector<32x32xf32>
    %cst_19 = arith.constant dense<0.000000e+00> : vector<16x32xf32>
    %20 = tpu.matmul %18, %19, %cst_19 {dimension_numbers = #tpu.dot_dimension_numbers<[1], [0], [0], [1], [0, 0, 1, 1], [], []>} : vector<16x32xf32>, vector<32x32xf32>, vector<16x32xf32> -> vector<16x32xf32>
    %c0_20 = arith.constant 0 : index
    %c0_21 = arith.constant 0 : index
    %21 = vector.load %arg10[%c0_20, %c0_21] : memref<1x32xf32, #tpu.memory_space<vmem>>, vector<1x32xf32>
    %22 = vector.broadcast %21 : vector<1x32xf32> to vector<16x32xf32>
    %23 = arith.addf %20, %22 : vector<16x32xf32>
    %cst_22 = arith.constant 0.000000e+00 : f32
    %24 = vector.broadcast %cst_22 : f32 to vector<16x32xf32>
    %25 = arith.maximumf %23, %24 : vector<16x32xf32>
    %c0_23 = arith.constant 0 : index
    %c0_24 = arith.constant 0 : index
    %26 = vector.load %arg11[%c0_23, %c0_24] : memref<32x32xf32, #tpu.memory_space<vmem>>, vector<32x32xf32>
    %cst_25 = arith.constant dense<0.000000e+00> : vector<16x32xf32>
    %27 = tpu.matmul %25, %26, %cst_25 {dimension_numbers = #tpu.dot_dimension_numbers<[1], [0], [0], [1], [0, 0, 1, 1], [], []>} : vector<16x32xf32>, vector<32x32xf32>, vector<16x32xf32> -> vector<16x32xf32>
    %c0_26 = arith.constant 0 : index
    %c0_27 = arith.constant 0 : index
    %28 = vector.load %arg3[%c0_26, %c0_27] : memref<16x32xf32, #tpu.memory_space<vmem>>, vector<16x32xf32>
    %c0_28 = arith.constant 0 : index
    %c0_29 = arith.constant 0 : index
    %29 = vector.load %arg12[%c0_28, %c0_29] : memref<32x32xf32, #tpu.memory_space<vmem>>, vector<32x32xf32>
    %cst_30 = arith.constant dense<0.000000e+00> : vector<16x32xf32>
    %30 = tpu.matmul %28, %29, %cst_30 {dimension_numbers = #tpu.dot_dimension_numbers<[1], [0], [0], [1], [0, 0, 1, 1], [], []>} : vector<16x32xf32>, vector<32x32xf32>, vector<16x32xf32> -> vector<16x32xf32>
    %31 = arith.addf %27, %30 : vector<16x32xf32>
    %c0_31 = arith.constant 0 : index
    %c0_32 = arith.constant 0 : index
    %32 = vector.load %arg13[%c0_31, %c0_32] : memref<1x32xf32, #tpu.memory_space<vmem>>, vector<1x32xf32>
    %33 = vector.broadcast %32 : vector<1x32xf32> to vector<16x32xf32>
    %34 = arith.addf %31, %33 : vector<16x32xf32>
    %cst_33 = arith.constant 0.000000e+00 : f32
    %35 = vector.broadcast %cst_33 : f32 to vector<16x32xf32>
    %36 = arith.maximumf %34, %35 : vector<16x32xf32>
    %c0_34 = arith.constant 0 : index
    %c0_35 = arith.constant 0 : index
    %37 = vector.load %arg14[%c0_34, %c0_35] : memref<32x32xf32, #tpu.memory_space<vmem>>, vector<32x32xf32>
    %cst_36 = arith.constant dense<0.000000e+00> : vector<16x32xf32>
    %38 = tpu.matmul %36, %37, %cst_36 {dimension_numbers = #tpu.dot_dimension_numbers<[1], [0], [0], [1], [0, 0, 1, 1], [], []>} : vector<16x32xf32>, vector<32x32xf32>, vector<16x32xf32> -> vector<16x32xf32>
    %c0_37 = arith.constant 0 : index
    %c0_38 = arith.constant 0 : index
    %39 = vector.load %arg15[%c0_37, %c0_38] : memref<1x32xf32, #tpu.memory_space<vmem>>, vector<1x32xf32>
    %40 = vector.broadcast %39 : vector<1x32xf32> to vector<16x32xf32>
    %41 = arith.addf %38, %40 : vector<16x32xf32>
    %cst_39 = arith.constant 0.000000e+00 : f32
    %42 = vector.broadcast %cst_39 : f32 to vector<16x32xf32>
    %43 = arith.maximumf %41, %42 : vector<16x32xf32>
    %c0_40 = arith.constant 0 : index
    %c0_41 = arith.constant 0 : index
    %44 = vector.load %arg16[%c0_40, %c0_41] : memref<1x32xf32, #tpu.memory_space<vmem>>, vector<1x32xf32>
    %45 = vector.broadcast %44 : vector<1x32xf32> to vector<16x32xf32>
    %46 = arith.mulf %43, %45 : vector<16x32xf32>
    %cst_42 = arith.constant dense<0.000000e+00> : vector<16xf32>
    %47 = vector.multi_reduction <add>, %46, %cst_42 [1] : vector<16x32xf32> to vector<16xf32>
    %48 = vector.shape_cast %47 : vector<16xf32> to vector<16x1xf32>
    %c0_43 = arith.constant 0 : index
    %c0_44 = arith.constant 0 : index
    %49 = vector.load %arg17[%c0_43, %c0_44] : memref<1x1xf32, #tpu.memory_space<vmem>>, vector<1x1xf32>
    %50 = vector.broadcast %49 : vector<1x1xf32> to vector<16x1xf32>
    %51 = arith.addf %48, %50 : vector<16x1xf32>
    %c0_45 = arith.constant 0 : index
    %c0_46 = arith.constant 0 : index
    %52 = vector.load %arg18[%c0_45, %c0_46] : memref<16x1xf32, #tpu.memory_space<vmem>>, vector<16x1xf32>
    tpu.vector_store %arg18[%c0_45, %c0_46], %51 {strides = array<i32>} : memref<16x1xf32, #tpu.memory_space<vmem>>, vector<16x1xf32>,
    return
  }
  func.func @transform_0(%arg0: i32) -> (i32, i32) {
    %c0_i32 = arith.constant 0 : i32
    %c0_i32_0 = arith.constant 0 : i32
    return %arg0, %c0_i32 : i32, i32
  }
  func.func @transform_1(%arg0: i32) -> (i32, i32) {
    %c0_i32 = arith.constant 0 : i32
    %c0_i32_0 = arith.constant 0 : i32
    return %arg0, %c0_i32 : i32, i32
  }
  func.func @transform_2(%arg0: i32) -> (i32, i32) {
    %c0_i32 = arith.constant 0 : i32
    %c0_i32_0 = arith.constant 0 : i32
    return %arg0, %c0_i32 : i32, i32
  }
  func.func @transform_3(%arg0: i32) -> (i32, i32) {
    %c0_i32 = arith.constant 0 : i32
    %c0_i32_0 = arith.constant 0 : i32
    %c0_i32_1 = arith.constant 0 : i32
    return %c0_i32, %c0_i32_0 : i32, i32
  }
  func.func @transform_4(%arg0: i32) -> (i32, i32) {
    %c0_i32 = arith.constant 0 : i32
    %c0_i32_0 = arith.constant 0 : i32
    %c0_i32_1 = arith.constant 0 : i32
    return %c0_i32, %c0_i32_0 : i32, i32
  }
  func.func @transform_5(%arg0: i32) -> (i32, i32) {
    %c0_i32 = arith.constant 0 : i32
    %c0_i32_0 = arith.constant 0 : i32
    %c0_i32_1 = arith.constant 0 : i32
    return %c0_i32, %c0_i32_0 : i32, i32
  }
  func.func @transform_6(%arg0: i32) -> (i32, i32) {
    %c0_i32 = arith.constant 0 : i32
    %c0_i32_0 = arith.constant 0 : i32
    %c0_i32_1 = arith.constant 0 : i32
    return %c0_i32, %c0_i32_0 : i32, i32
  }
  func.func @transform_7(%arg0: i32) -> (i32, i32) {
    %c0_i32 = arith.constant 0 : i32
    %c0_i32_0 = arith.constant 0 : i32
    %c0_i32_1 = arith.constant 0 : i32
    return %c0_i32, %c0_i32_0 : i32, i32
  }
  func.func @transform_8(%arg0: i32) -> (i32, i32) {
    %c0_i32 = arith.constant 0 : i32
    %c0_i32_0 = arith.constant 0 : i32
    %c0_i32_1 = arith.constant 0 : i32
    return %c0_i32, %c0_i32_0 : i32, i32
  }
  func.func @transform_9(%arg0: i32) -> (i32, i32) {
    %c0_i32 = arith.constant 0 : i32
    %c0_i32_0 = arith.constant 0 : i32
    %c0_i32_1 = arith.constant 0 : i32
    return %c0_i32, %c0_i32_0 : i32, i32
  }
  func.func @transform_10(%arg0: i32) -> (i32, i32) {
    %c0_i32 = arith.constant 0 : i32
    %c0_i32_0 = arith.constant 0 : i32
    %c0_i32_1 = arith.constant 0 : i32
    return %c0_i32, %c0_i32_0 : i32, i32
  }
  func.func @transform_11(%arg0: i32) -> (i32, i32) {
    %c0_i32 = arith.constant 0 : i32
    %c0_i32_0 = arith.constant 0 : i32
    %c0_i32_1 = arith.constant 0 : i32
    return %c0_i32, %c0_i32_0 : i32, i32
  }
  func.func @transform_12(%arg0: i32) -> (i32, i32) {
    %c0_i32 = arith.constant 0 : i32
    %c0_i32_0 = arith.constant 0 : i32
    %c0_i32_1 = arith.constant 0 : i32
    return %c0_i32, %c0_i32_0 : i32, i32
  }
  func.func @transform_13(%arg0: i32) -> (i32, i32) {
    %c0_i32 = arith.constant 0 : i32
    %c0_i32_0 = arith.constant 0 : i32
    %c0_i32_1 = arith.constant 0 : i32
    return %c0_i32, %c0_i32_0 : i32, i32
  }
  func.func @transform_14(%arg0: i32) -> (i32, i32) {
    %c0_i32 = arith.constant 0 : i32
    %c0_i32_0 = arith.constant 0 : i32
    %c0_i32_1 = arith.constant 0 : i32
    return %c0_i32, %c0_i32_0 : i32, i32
  }
  func.func @transform_15(%arg0: i32) -> (i32, i32) {
    %c0_i32 = arith.constant 0 : i32
    %c0_i32_0 = arith.constant 0 : i32
    %c0_i32_1 = arith.constant 0 : i32
    return %c0_i32, %c0_i32_0 : i32, i32
  }
  func.func @transform_16(%arg0: i32) -> (i32, i32) {
    %c0_i32 = arith.constant 0 : i32
    %c0_i32_0 = arith.constant 0 : i32
    %c0_i32_1 = arith.constant 0 : i32
    return %c0_i32, %c0_i32_0 : i32, i32
  }
  func.func @transform_17(%arg0: i32) -> (i32, i32) {
    %c0_i32 = arith.constant 0 : i32
    %c0_i32_0 = arith.constant 0 : i32
    return %arg0, %c0_i32 : i32, i32
  }
}

</mosaic_0001>

<bundles_post_ra>
// kernel: run.5
= control target key start
LH: loop header
LB: loop body
LE: loop exit
PB: predicated region body
PF: predicated region fallthrough
CT: control target
= control target key end

     0   :  { %vm139_vm0 = vcmask 523264   ;;  %v1475_v18 = vmov 0.0   ;;  %v1476_v19 = vmov 0   ;;  %vm288_vm1 = vcmask 261120   ;;  %s1478_s13 = smov 32   ;;  %s2044_s3 = inlined_call_operand.vmem [shape: bf16[64,32], index: 3, kind: input, shape index: {}]   ;;  %s2045_s0 = inlined_call_operand.vmem [shape: bf16[8,16,64], index: 0, kind: input, shape index: {}]   ;;  %s2046_s5 = inlined_call_operand.vmem [shape: f32[32,64], index: 5, kind: input, shape index: {}]   ;;  %s2047_s7 = inlined_call_operand.vmem [shape: bf16[32,32], index: 7, kind: input, shape index: {}]   ;;  %s2048_s2 = inlined_call_operand.vmem [shape: bf16[16,32], index: 2, kind: input, shape index: {}]   ;;  %s2049_s1 = inlined_call_operand.vmem [shape: f32[8,16,1], index: 1, kind: input, shape index: {}]   ;;  %s2050_s4 = inlined_call_operand.vmem [shape: f32[1,32], index: 4, kind: input, shape index: {}]   ;;  %s2051_s8 = inlined_call_operand.vmem [shape: f32[1,32], index: 8, kind: input, shape index: {}]   ;;  %s2052_s6 = inlined_call_operand.vmem [shape: f32[1,64], index: 6, kind: input, shape index: {}]   ;;  %s2053_s9 = inlined_call_operand.<no memory space> [shape: f32[1,1], index: 9, kind: input, shape index: {}]   ;;  %s2054_s10 = inlined_call_operand.vmem [shape: f32[32,32], index: 10, kind: input, shape index: {}]   ;;  %s2055_s11 = inlined_call_operand.vmem [shape: f32[1,32], index: 11, kind: input, shape index: {}]   ;;  %s2056_s12 = inlined_call_operand.vmem [shape: f32[16,32], index: 12, kind: output, shape index: {}]  }
   0x1   :  { %v1424_v0 = vld [vmem:[%s2044_s3] sm:$0xff]   ;;  %v1425_v1 = vld [vmem:[%s2044_s3 + $0x8] sm:$0xff]   ;;  %v1426_v2 = vld [vmem:[%s2044_s3 + $0x10] sm:$0xff]   ;;  %1422 = vset.pattern.permute.xlu0 %v1476_v19  ;;  %1423 = vset.pattern.permute.xlu1 %v1476_v19  ;;  %vm1477_vm2 = vmmov 0   ;;  %vm1091_vm3 = vcmask 7168  }
   0x2   :  { %1326 = vmatprep.subr.bf16.mxu0 %v1424_v0  ;;  %v1428_v3 = vld [vmem:[%s2045_s0] sm:$0xff]   ;;  %v1427_v4 = vld [vmem:[%s2044_s3 + $0x18] sm:$0xff]   ;;  %v278_v6 = vld [vmem:[%s2046_s5 + $0x8] sm:$0xff] }
   0x3   :  { %1327 = vmatpush3.bf16.msra.mxu0 %v1424_v0  ;;  %1334 = vmatprep.mubr.msk.bf16.mxu0 %vm139_vm0, %v1428_v3  ;;  %v277_v5 = vld [vmem:[%s2046_s5] sm:$0xff]  ;;  %v1429_v8 = vld [vmem:[%s2045_s0 + $0x8] sm:$0xff]   ;;  %v1430_v9 = vld [vmem:[%s2045_s0 + $0x10] sm:$0xff]  }
   0x4   :  { %1328 = vmatprep.subr.bf16.mxu0 %v1425_v1  ;;  %v1401_v7 = vpack.c.bf16 %v278_v6, %v277_v5  ;;  %v1431_v10 = vld [vmem:[%s2045_s0 + $0x18] sm:$0xff]   ;;  %v1432_v11 = vld [vmem:[%s2045_s0 + $0x20] sm:$0xff]   ;;  %v1433_v12 = vld [vmem:[%s2045_s0 + $0x28] sm:$0xff]  }
   0x5   :  { %v1434_v13 = vld [vmem:[%s2045_s0 + $0x30] sm:$0xff]   ;;  %v1435_v14 = vld [vmem:[%s2045_s0 + $0x38] sm:$0xff]   ;;  %v1605_v20 = vld [vmem:[%s2049_s1] sm:$0xff] }
   0x6   :  { %1402 = vmatprep.subr.bf16.mxu1 %v1401_v7  ;;  %v279_v15 = vld [vmem:[%s2046_s5 + $0x10] sm:$0xff]  ;;  %v280_v16 = vld [vmem:[%s2046_s5 + $0x18] sm:$0xff]  ;;  %567 = vperm.xlu0 %1422, %v1605_v20   ;;  %v1611_v21 = vld [vmem:[%s2049_s1 + $0x8] sm:$0xff] }
   0x7   :  { %1329 = vmatpush3.bf16.msra.mxu0 %v1425_v1  ;;  %1404 = vmatpush3.bf16.msra.mxu1 %v1401_v7  ;;  %v1405_v17 = vpack.c.bf16 %v280_v16, %v279_v15  ;;  %v1616_v22 = vld [vmem:[%s2049_s1 + $0x10] sm:$0xff]  ;;  %v1622_v23 = vld [vmem:[%s2049_s1 + $0x18] sm:$0xff]  ;;  %v1628_v24 = vld [vmem:[%s2049_s1 + $0x20] sm:$0xff] }
   0x8   :  { %1330 = vmatprep.subr.bf16.mxu0 %v1426_v2  ;;  %572 = vperm.xlu1 %1423, %v1611_v21   ;;  %v1634_v25 = vld [vmem:[%s2049_s1 + $0x28] sm:$0xff]  ;;  %v1640_v26 = vld [vmem:[%s2049_s1 + $0x30] sm:$0xff]  ;;  %v1646_v27 = vld [vmem:[%s2049_s1 + $0x38] sm:$0xff] }
   0x9   :  { %1406 = vmatprep.subr.bf16.mxu1 %v1405_v17  ;;  %v1652_v28 = vld [vmem:[%s2049_s1 + $0x40] sm:$0xff]  ;;  %v1658_v29 = vld [vmem:[%s2049_s1 + $0x48] sm:$0xff]  ;;  %v1664_v30 = vld [vmem:[%s2049_s1 + $0x50] sm:$0xff] }
   0xa   :  { %577 = vperm.xlu0 %1422, %v1616_v22   ;;  %v1670_v31 = vld [vmem:[%s2049_s1 + $0x58] sm:$0xff]  ;;  %v1676_v32 = vld [vmem:[%s2049_s1 + $0x60] sm:$0xff]  ;;  %v1682_v33 = vld [vmem:[%s2049_s1 + $0x68] sm:$0xff] }
   0xb   :  { %1331 = vmatpush3.bf16.msra.mxu0 %v1426_v2  ;;  %1408 = vmatpush3.bf16.msra.mxu1 %v1405_v17  ;;  %v1688_v34 = vld [vmem:[%s2049_s1 + $0x70] sm:$0xff]  ;;  %v1694_v35 = vld [vmem:[%s2049_s1 + $0x78] sm:$0xff]  ;;  %v1701_v36 = vld [vmem:[%s2050_s4] ss:$0 sm:$0xff] }
   0xc   :  { %1332 = vmatprep.subr.bf16.mxu0 %v1427_v4  ;;  %1382 = vmatprep.subr.bf16.mxu1 %v1475_v18  ;;  %v1436_v45 = vld [vmem:[%s2047_s7] sm:$0xff]   ;;  %v1437_v51 = vld [vmem:[%s2047_s7 + $0x8] sm:$0xff]  }
   0xd   :  { %582 = vperm.xlu1 %1423, %v1622_v23  }
   0xe   :  { %587 = vperm.xlu0 %1422, %v1628_v24  }
   0xf   :  { %1333 = vmatpush3.bf16.msra.mxu0 %v1427_v4 }
  0x11   :  { %592 = vperm.xlu1 %1423, %v1634_v25  }
  0x12   :  { %1335 = vmatmul.mubr.msk.bf16.vlgmr.msra.gmra.mrb[0].mxu0 %vm139_vm0, %v1429_v8  ;;  %597 = vperm.xlu0 %1422, %v1640_v26  }
  0x13   :  { %1338 = vmatprep.mubr.msk.bf16.mxu0 %vm139_vm0, %v1430_v9 }
  0x15   :  { %602 = vperm.xlu1 %1423, %v1646_v27  }
  0x16   :  { %607 = vperm.xlu0 %1422, %v1652_v28  }
  0x19   :  { %612 = vperm.xlu1 %1423, %v1658_v29  }
  0x1a   :  { %1339 = vmatmul.mubr.msk.bf16.gmra.mrb[4].mxu0 %vm139_vm0, %v1431_v10  ;;  %617 = vperm.xlu0 %1422, %v1664_v30  }
  0x1b   :  { %1342 = vmatprep.mubr.msk.bf16.mxu0 %vm139_vm0, %v1432_v11 }
  0x1d   :  { %622 = vperm.xlu1 %1423, %v1670_v31  }
  0x1e   :  { %627 = vperm.xlu0 %1422, %v1676_v32  }
  0x21   :  { %632 = vperm.xlu1 %1423, %v1682_v33  }
  0x22   :  { %1343 = vmatmul.mubr.msk.bf16.gmra.mrb[8].mxu0 %vm139_vm0, %v1433_v12  ;;  %637 = vperm.xlu0 %1422, %v1688_v34  }
  0x23   :  { %1346 = vmatprep.mubr.msk.bf16.mxu0 %vm139_vm0, %v1434_v13 }
  0x25   :  { %642 = vperm.xlu1 %1423, %v1694_v35  }
  0x2a   :  { %1347 = vmatmul.mubr.msk.bf16.gmra.mrb[12].mxu0 %vm139_vm0, %v1435_v14 }
  0xe5   :  { %v1336_v37 = vpop.f32.mrb[0].mxu0 }
  0xe6   :  { %v198_v38 = vpop.f32.mrb[1].mxu0  ;;  %v207_v41 = vadd.f32 %v1336_v37, %v1701_v36 }
  0xe7   :  { %v199_v39 = vadd.f32 %v1701_v36, %v198_v38  ;;  %v1337_v40 = vpop.f32.mrb[2].mxu0 }
  0xe8   :  { %v201_v42 = vpop.f32.mrb[3].mxu0  ;;  %v210_v46 = vadd.f32 %v1337_v40, %v1701_v36  ;;  %v263_v48 = vmax.f32 %v207_v41, 0.0  ;;  %v1438_v41 = vld [vmem:[%s2048_s2] sm:$0xff]  }
  0xe9   :  { %v261_v43 = vmax.f32 %v199_v39, 0.0  ;;  %v202_v44 = vadd.f32 %v1701_v36, %v201_v42 }
  0xea   :  { %v264_v52 = vmax.f32 %v210_v46, 0.0 }
  0xeb   :  { %v262_v47 = vmax.f32 %v202_v44, 0.0  ;;  %1358 = vmatprep.mubr.msk.f32.mxu1 %vm288_vm1, %v261_v43 }
  0xed   :  { %v1340_v49 = vpop.f32.mrb[4].mxu0  ;;  %1359 = vmatmul.mubr.msk.f32.vlgmr.msra.gmra.mrb[0].mxu1 %vm288_vm1, %v262_v47  ;;  %v568_v47 = vpop.permute.xlu0 %567 }
  0xee   :  { %1383 = vmatpush3.bf16.msra.mxu1 %v1436_v45  ;;  %v214_v50 = vpop.f32.mrb[5].mxu0  ;;  %1361 = vmatprep.mubr.msk.f32.mxu1 %vm288_vm1, %v263_v48  ;;  %v223_v55 = vadd.f32 %v1340_v49, %v1701_v36 }
  0xef   :  { %v215_v53 = vadd.f32 %v1701_v36, %v214_v50  ;;  %v1341_v54 = vpop.f32.mrb[6].mxu0  ;;  %1384 = vmatprep.subr.bf16.mxu1 %v1475_v18 }
  0xf0   :  { %v217_v56 = vpop.f32.mrb[7].mxu0  ;;  %v226_v59 = vadd.f32 %v1341_v54, %v1701_v36  ;;  %v267_v61 = vmax.f32 %v223_v55, 0.0 }
  0xf1   :  { %v265_v57 = vmax.f32 %v215_v53, 0.0  ;;  %v218_v58 = vadd.f32 %v1701_v36, %v217_v56  ;;  %1362 = vmatmul.mubr.msk.f32.gmra.mrb[2].mxu1 %vm288_vm1, %v264_v52  ;;  %v578_v52 = vpop.permute.xlu0 %577  ;;  %v573_v53 = vpop.permute.xlu1 %572 }
  0xf2   :  { %1385 = vmatpush3.bf16.msra.mxu1 %v1437_v51  ;;  %v268_v0 = vmax.f32 %v226_v59, 0.0 }
  0xf3   :  { %v266_v60 = vmax.f32 %v218_v58, 0.0  ;;  %1364 = vmatprep.mubr.msk.f32.mxu1 %vm288_vm1, %v265_v57 }
  0xf5   :  { %v1344_v62 = vpop.f32.mrb[8].mxu0  ;;  %1365 = vmatmul.mubr.msk.f32.gmra.mrb[4].mxu1 %vm288_vm1, %v266_v60  ;;  %v588_v56 = vpop.permute.xlu0 %587 }
  0xf6   :  { %v230_v63 = vpop.f32.mrb[9].mxu0  ;;  %1367 = vmatprep.mubr.msk.f32.mxu1 %vm288_vm1, %v267_v61  ;;  %v239_v3 = vadd.f32 %v1344_v62, %v1701_v36  ;;  %v583_v59 = vpop.permute.xlu1 %582 }
  0xf7   :  { %v231_v1 = vadd.f32 %v1701_v36, %v230_v63  ;;  %v1345_v2 = vpop.f32.mrb[10].mxu0 }
  0xf8   :  { %v233_v4 = vpop.f32.mrb[11].mxu0  ;;  %v242_v7 = vadd.f32 %v1345_v2, %v1701_v36  ;;  %v271_v9 = vmax.f32 %v239_v3, 0.0 }
  0xf9   :  { %v269_v5 = vmax.f32 %v231_v1, 0.0  ;;  %v234_v6 = vadd.f32 %v1701_v36, %v233_v4  ;;  %1368 = vmatmul.mubr.msk.f32.gmra.mrb[6].mxu1 %vm288_vm1, %v268_v0  ;;  %v598_v62 = vpop.permute.xlu0 %597 }
  0xfa   :  { %v272_v12 = vmax.f32 %v242_v7, 0.0  ;;  %v593_v63 = vpop.permute.xlu1 %592 }
  0xfb   :  { %v270_v8 = vmax.f32 %v234_v6, 0.0  ;;  %1370 = vmatprep.mubr.msk.f32.mxu1 %vm288_vm1, %v269_v5 }
  0xfd   :  { %v1348_v10 = vpop.f32.mrb[12].mxu0  ;;  %1371 = vmatmul.mubr.msk.f32.gmra.mrb[8].mxu1 %vm288_vm1, %v270_v8  ;;  %v608_v6 = vpop.permute.xlu0 %607 }
  0xfe   :  { %v246_v11 = vpop.f32.mrb[13].mxu0  ;;  %1373 = vmatprep.mubr.msk.f32.mxu1 %vm288_vm1, %v271_v9  ;;  %v255_v15 = vadd.f32 %v1348_v10, %v1701_v36  ;;  %v603_v9 = vpop.permute.xlu1 %602 }
  0xff   :  { %v247_v13 = vadd.f32 %v1701_v36, %v246_v11  ;;  %v1349_v14 = vpop.f32.mrb[14].mxu0 }
 0x100   :  { %v249_v16 = vpop.f32.mrb[15].mxu0  ;;  %v258_v37 = vadd.f32 %v1349_v14, %v1701_v36  ;;  %v275_v39 = vmax.f32 %v255_v15, 0.0 }
 0x101   :  { %v273_v17 = vmax.f32 %v247_v13, 0.0  ;;  %v250_v19 = vadd.f32 %v1701_v36, %v249_v16  ;;  %1374 = vmatmul.mubr.msk.f32.gmra.mrb[10].mxu1 %vm288_vm1, %v272_v12  ;;  %v1280_v36 = vld [vmem:[%s2051_s8] ss:$0 sm:$0xff]  ;;  %v618_v12 = vpop.permute.xlu0 %617 }
 0x102   :  { %v276_v40 = vmax.f32 %v258_v37, 0.0  ;;  %763 = vrot.lane.b32.xlu1 %v1280_v36, %s1478_s13  ;;  %v613_v13 = vpop.permute.xlu1 %612 }
 0x103   :  { %v274_v38 = vmax.f32 %v250_v19, 0.0  ;;  %1376 = vmatprep.mubr.msk.f32.mxu1 %vm288_vm1, %v273_v17 }
 0x105   :  { %1377 = vmatmul.mubr.msk.f32.gmra.mrb[12].mxu1 %vm288_vm1, %v274_v38  ;;  %v628_v19 = vpop.permute.xlu0 %627 }
 0x106   :  { %1379 = vmatprep.mubr.msk.f32.mxu1 %vm288_vm1, %v275_v39  ;;  %v623_v37 = vpop.permute.xlu1 %622 }
 0x109   :  { %1380 = vmatmul.mubr.msk.f32.gmra.mrb[14].mxu1 %vm288_vm1, %v276_v40  ;;  %v638_v40 = vpop.permute.xlu0 %637 }
 0x10a   :  { %1386 = vmatprep.mubr.msk.bf16.mxu1 %vm1477_vm2, %v1475_v18 }
 0x10d   :  { %1387 = vmatmul.mubr.msk.bf16.vlgmr.msra.gmra.mrb[16].mxu1 %vm288_vm1, %v1438_v41  ;;  %v633_v41 = vpop.permute.xlu1 %632 }
 0x1c0   :  { %v1751_v42 = vpop.f32.mrb[0].mxu1 }
 0x1c1   :  { %v1753_v43 = vpop.f32.mrb[1].mxu1 }
 0x1c4   :  { %v1755_v44 = vpop.f32.mrb[2].mxu1 }
 0x1c5   :  { %v1757_v45 = vpop.f32.mrb[3].mxu1 }
 0x1c8   :  { %v1759_v46 = vpop.f32.mrb[4].mxu1 }
 0x1c9   :  { %v1761_v18 = vpop.f32.mrb[5].mxu1 }
 0x1cc   :  { %v1763_v48 = vpop.f32.mrb[6].mxu1 }
 0x1cd   :  { %v1765_v49 = vpop.f32.mrb[7].mxu1 }
 0x1d0   :  { %v1767_v50 = vpop.f32.mrb[8].mxu1 }
 0x1d1   :  { %v1769_v51 = vpop.f32.mrb[9].mxu1 }
 0x1d4   :  { %v1771_v54 = vpop.f32.mrb[10].mxu1 }
 0x1d5   :  { %v1773_v55 = vpop.f32.mrb[11].mxu1 }
 0x1d8   :  { %v1775_v57 = vpop.f32.mrb[12].mxu1 }
 0x1d9   :  { %v1777_v58 = vpop.f32.mrb[13].mxu1 }
 0x1dc   :  { %v1779_v60 = vpop.f32.mrb[14].mxu1 }
 0x1dd   :  { %v1781_v61 = vpop.f32.mrb[15].mxu1 }
 0x1e0   :  { %v558_v0 = vpop.f32.mrb[16].mxu1 }
 0x1e1   :  { %v1388_v1 = vpop.f32.mrb[17].mxu1  ;;  %v647_v2 = vmul.f32 %v578_v52, %v558_v0  ;;  %v645_v3 = vmul.f32 %v568_v47, %v558_v0  ;;  %v653_v7 = vmul.f32 %v608_v6, %v558_v0  ;;  %v649_v8 = vmul.f32 %v588_v56, %v558_v0 }
 0x1e2   :  { %v561_v4 = vpop.f32.mrb[18].mxu1  ;;  %v651_v10 = vmul.f32 %v598_v62, %v558_v0  ;;  %v655_v16 = vmul.f32 %v618_v12, %v558_v0  ;;  %v657_v38 = vmul.f32 %v628_v19, %v558_v0  ;;  %v659_v36 = vmul.f32 %v638_v40, %v558_v0  ;;  %v1804_v62 = vld [vmem:[%s2052_s6] ss:$0 sm:$0xff]  ;;  %s1479_s6 = smov 96  }
 0x1e3   :  { %681 = vrot.lane.b32.xlu1 %v647_v2, %s1478_s13  ;;  %677 = vrot.lane.b32.xlu0 %v645_v3, %s1478_s13  ;;  %v1389_v5 = vpop.f32.mrb[19].mxu1  ;;  %v648_v11 = vmul.f32 %v583_v59, %v561_v4  ;;  %v650_v14 = vmul.f32 %v593_v63, %v561_v4  ;;  %v646_v15 = vmul.f32 %v573_v53, %v561_v4  ;;  %v643_v53 = vpop.permute.xlu1 %642 }
 0x1e4   :  { %v652_v17 = vmul.f32 %v603_v9, %v561_v4  ;;  %v654_v39 = vmul.f32 %v613_v13, %v561_v4  ;;  %v656_v47 = vmul.f32 %v623_v37, %v561_v4  ;;  %v658_v52 = vmul.f32 %v633_v41, %v561_v4 }
 0x1e5   :  { %v660_v56 = vmul.f32 %v643_v53, %v561_v4  ;;  %v1808_v63 = vadd.f32 %v1804_v62, %v1753_v43  ;;  %v1812_v0 = vadd.f32 %v1804_v62, %v1757_v45  ;;  %v1818_v5 = vadd.f32 %v1804_v62, %v1761_v18 }
 0x1e6   :  { %v1829_v12 = vadd.f32 %v1755_v44, %v1804_v62  ;;  %v1833_v18 = vadd.f32 %v1804_v62, %v1765_v49  ;;  %v1843_v49 = vadd.f32 %v1751_v42, %v1804_v62  ;;  %v1847_v19 = vadd.f32 %v1759_v46, %v1804_v62 }
 0x1e7   :  { %693 = vrot.lane.b32.xlu1 %v653_v7, %s1478_s13  ;;  %685 = vrot.lane.b32.xlu0 %v649_v8, %s1478_s13  ;;  %v1799_v59 = vpop.permute.xlu1 %763  ;;  %v1856_v53 = vadd.f32 %v1763_v48, %v1804_v62  ;;  %v1860_v46 = vadd.f32 %v1804_v62, %v1773_v55  ;;  %v1870_v55 = vadd.f32 %v1767_v50, %v1804_v62 }
 0x1eb   :  { %689 = vrot.lane.b32.xlu0 %v651_v10, %s1478_s13  ;;  %683 = vrot.lane.b32.xlu1 %v648_v11, %s1478_s13  ;;  %v1825_v11 = vadd.f32 %v1804_v62, %v1769_v51 }
 0x1ef   :  { %687 = vrot.lane.b32.xlu1 %v650_v14, %s1478_s13  ;;  %679 = vrot.lane.b32.xlu0 %v646_v15, %s1478_s13 }
 0x1f3   :  { %697 = vrot.lane.b32.xlu1 %v655_v16, %s1478_s13  ;;  %691 = vrot.lane.b32.xlu0 %v652_v17, %s1478_s13 }
 0x1f7   :  { %701 = vrot.lane.b32.xlu1 %v657_v38, %s1478_s13  ;;  %695 = vrot.lane.b32.xlu0 %v654_v39, %s1478_s13 }
 0x1fb   :  { %705 = vrot.lane.b32.xlu1 %v659_v36, %s1478_s13  ;;  %699 = vrot.lane.b32.xlu0 %v656_v47, %s1478_s13 }
 0x1ff   :  { %703 = vrot.lane.b32.xlu0 %v658_v52, %s1478_s13 }
 0x203   :  { %707 = vrot.lane.b32.xlu0 %v660_v56, %s1478_s13 }
 0x255   :  { %v682_v1 = vpop.permute.xlu1 %681  ;;  %v678_v2 = vpop.permute.xlu0 %677 }
 0x256   :  { %v727_v3 = vadd.f32 %v682_v1, %v1812_v0  ;;  %v725_v4 = vadd.f32 %v678_v2, %v1808_v63 }
 0x258   :  { %v743_v6 = vmax.f32 %v727_v3, 0.0  ;;  %v741_v7 = vmax.f32 %v725_v4, 0.0 }
 0x259   :  { %v694_v8 = vpop.permute.xlu1 %693  ;;  %v686_v9 = vpop.permute.xlu0 %685 }
 0x25a   :  { %v768_v43 = vmul.f32 %v1799_v59, %v743_v6  ;;  %v766_v10 = vmul.f32 %v1799_v59, %v741_v7  ;;  %v729_v45 = vadd.f32 %v686_v9, %v1818_v5  ;;  %v733_v14 = vadd.f32 %v694_v8, %v1825_v11 }
 0x25b   :  { %v1874_v8 = vadd.f32 %v1804_v62, %v1777_v58  ;;  %v1884_v58 = vadd.f32 %v1771_v54, %v1804_v62 }
 0x25c   :  { %v745_v13 = vmax.f32 %v729_v45, 0.0  ;;  %802 = vrot.lane.b32.xlu0 %v768_v43, %s1479_s6  ;;  %798 = vrot.lane.b32.xlu1 %v766_v10, %s1479_s6  ;;  %v749_v39 = vmax.f32 %v733_v14, 0.0 }
 0x25d   :  { %v690_v15 = vpop.permute.xlu0 %689  ;;  %v684_v16 = vpop.permute.xlu1 %683 }
 0x25e   :  { %v770_v51 = vmul.f32 %v1799_v59, %v745_v13  ;;  %v731_v17 = vadd.f32 %v690_v15, %v1833_v18  ;;  %v728_v44 = vadd.f32 %v684_v16, %v1829_v12  ;;  %v774_v1 = vmul.f32 %v1799_v59, %v749_v39 }
 0x25f   :  { %v1888_v16 = vadd.f32 %v1804_v62, %v1781_v61  ;;  %v1898_v61 = vadd.f32 %v1775_v57, %v1804_v62  ;;  %v1910_v57 = vadd.f32 %v1779_v60, %v1804_v62 }
 0x260   :  { %v747_v37 = vmax.f32 %v731_v17, 0.0  ;;  %v744_v38 = vmax.f32 %v728_v44, 0.0  ;;  %806 = vrot.lane.b32.xlu1 %v770_v51, %s1479_s6 }
 0x261   :  { %v688_v40 = vpop.permute.xlu1 %687  ;;  %v680_v41 = vpop.permute.xlu0 %679 }
 0x262   :  { %v772_v36 = vmul.f32 %v1799_v59, %v747_v37  ;;  %v769_v47 = vmul.f32 %v1799_v59, %v744_v38  ;;  %v730_v52 = vadd.f32 %v688_v40, %v1847_v19  ;;  %v726_v42 = vadd.f32 %v680_v41, %v1843_v49 }
 0x264   :  { %v746_v56 = vmax.f32 %v730_v52, 0.0  ;;  %804 = vrot.lane.b32.xlu0 %v769_v47, %s1479_s6  ;;  %810 = vrot.lane.b32.xlu1 %v772_v36, %s1479_s6  ;;  %v742_v6 = vmax.f32 %v726_v42, 0.0  ;;  %v17_v47 = vstv %s2053_s9 }
 0x265   :  { %v698_v2 = vpop.permute.xlu1 %697  ;;  %v692_v3 = vpop.permute.xlu0 %691  ;;  %18 = vst [vmem:[#allocation2] sm:$0x1] %v17_v47 }
 0x266   :  { %v771_v4 = vmul.f32 %v1799_v59, %v746_v56  ;;  %v735_v7 = vadd.f32 %v698_v2, %v1860_v46  ;;  %v732_v48 = vadd.f32 %v692_v3, %v1856_v53  ;;  %v767_v13 = vmul.f32 %v1799_v59, %v742_v6 }
 0x268   :  { %v748_v9 = vmax.f32 %v732_v48, 0.0  ;;  %808 = vrot.lane.b32.xlu0 %v771_v4, %s1479_s6  ;;  %814 = vrot.lane.b32.xlu1 %v774_v1, %s1479_s6  ;;  %v751_v43 = vmax.f32 %v735_v7, 0.0 }
 0x269   :  { %v702_v10 = vpop.permute.xlu1 %701  ;;  %v696_v45 = vpop.permute.xlu0 %695 }
 0x26a   :  { %v773_v14 = vmul.f32 %v1799_v59, %v748_v9  ;;  %v737_v15 = vadd.f32 %v702_v10, %v1874_v8  ;;  %v734_v50 = vadd.f32 %v696_v45, %v1870_v55  ;;  %v776_v17 = vmul.f32 %v1799_v59, %v751_v43 }
 0x26c   :  { %v750_v51 = vmax.f32 %v734_v50, 0.0  ;;  %812 = vrot.lane.b32.xlu0 %v773_v14, %s1479_s6  ;;  %800 = vrot.lane.b32.xlu1 %v767_v13, %s1479_s6  ;;  %v753_v38 = vmax.f32 %v737_v15, 0.0 }
 0x26d   :  { %v706_v44 = vpop.permute.xlu1 %705  ;;  %v700_v37 = vpop.permute.xlu0 %699 }
 0x26e   :  { %v775_v39 = vmul.f32 %v1799_v59, %v750_v51  ;;  %v739_v40 = vadd.f32 %v706_v44, %v1888_v16  ;;  %v736_v54 = vadd.f32 %v700_v37, %v1884_v58  ;;  %v778_v52 = vmul.f32 %v1799_v59, %v753_v38 }
 0x270   :  { %v752_v41 = vmax.f32 %v736_v54, 0.0  ;;  %816 = vrot.lane.b32.xlu0 %v775_v39, %s1479_s6  ;;  %818 = vrot.lane.b32.xlu1 %v776_v17, %s1479_s6  ;;  %v755_v42 = vmax.f32 %v739_v40, 0.0 }
 0x271   :  { %v704_v36 = vpop.permute.xlu0 %703 }
 0x272   :  { %v777_v56 = vmul.f32 %v1799_v59, %v752_v41  ;;  %v738_v1 = vadd.f32 %v704_v36, %v1898_v61  ;;  %v780_v4 = vmul.f32 %v1799_v59, %v755_v42 }
 0x274   :  { %v754_v2 = vmax.f32 %v738_v1, 0.0  ;;  %820 = vrot.lane.b32.xlu0 %v777_v56, %s1479_s6  ;;  %822 = vrot.lane.b32.xlu1 %v778_v52, %s1479_s6 }
 0x275   :  { %v708_v3 = vpop.permute.xlu0 %707 }
 0x276   :  { %v779_v6 = vmul.f32 %v1799_v59, %v754_v2  ;;  %v740_v7 = vadd.f32 %v708_v3, %v1910_v57 }
 0x278   :  { %v756_v48 = vmax.f32 %v740_v7, 0.0  ;;  %824 = vrot.lane.b32.xlu0 %v779_v6, %s1479_s6  ;;  %826 = vrot.lane.b32.xlu1 %v780_v4, %s1479_s6 }
 0x27a   :  { %v781_v60 = vmul.f32 %v1799_v59, %v756_v48 }
 0x27c   :  { %828 = vrot.lane.b32.xlu0 %v781_v60, %s1479_s6 }
 0x2ce   :  { %v803_v62 = vpop.permute.xlu0 %802  ;;  %v799_v9 = vpop.permute.xlu1 %798 }
 0x2cf   :  { %v852_v43 = vsel %vm288_vm1, %v803_v62, 0.0  ;;  %v846_v10 = vsel %vm288_vm1, %v799_v9, 0.0  ;;  %v1937_v62 = vld [vmem:[#allocation2] ss:$0 sm:$0xff] }
 0x2d0   :  { %853 = vadd.xlane.f32.xlu0 %v852_v43  ;;  %847 = vadd.xlane.f32.xlu1 %v846_v10 }
 0x2d2   :  { %v807_v45 = vpop.permute.xlu1 %806 }
 0x2d3   :  { %v858_v13 = vsel %vm288_vm1, %v807_v45, 0.0 }
 0x2d4   :  { %859 = vadd.xlane.f32.xlu0 %v858_v13 }
 0x2d6   :  { %v805_v14 = vpop.permute.xlu0 %804  ;;  %v811_v15 = vpop.permute.xlu1 %810 }
 0x2d7   :  { %v855_v50 = vsel %vm288_vm1, %v805_v14, 0.0  ;;  %v864_v59 = vsel %vm288_vm1, %v811_v15, 0.0 }
 0x2d8   :  { %856 = vadd.xlane.f32.xlu1 %v855_v50  ;;  %865 = vadd.xlane.f32.xlu0 %v864_v59 }
 0x2da   :  { %v809_v51 = vpop.permute.xlu0 %808  ;;  %v815_v17 = vpop.permute.xlu1 %814 }
 0x2db   :  { %v861_v44 = vsel %vm288_vm1, %v809_v51, 0.0  ;;  %v870_v37 = vsel %vm288_vm1, %v815_v17, 0.0 }
 0x2dc   :  { %862 = vadd.xlane.f32.xlu1 %v861_v44  ;;  %871 = vadd.xlane.f32.xlu0 %v870_v37 }
 0x2de   :  { %v813_v38 = vpop.permute.xlu0 %812  ;;  %v801_v39 = vpop.permute.xlu1 %800 }
 0x2df   :  { %v867_v40 = vsel %vm288_vm1, %v813_v38, 0.0  ;;  %v849_v54 = vsel %vm288_vm1, %v801_v39, 0.0 }
 0x2e0   :  { %868 = vadd.xlane.f32.xlu1 %v867_v40  ;;  %850 = vadd.xlane.f32.xlu0 %v849_v54 }
 0x2e2   :  { %v817_v41 = vpop.permute.xlu0 %816  ;;  %v819_v36 = vpop.permute.xlu1 %818 }
 0x2e3   :  { %v873_v47 = vsel %vm288_vm1, %v817_v41, 0.0  ;;  %v876_v52 = vsel %vm288_vm1, %v819_v36, 0.0 }
 0x2e4   :  { %874 = vadd.xlane.f32.xlu1 %v873_v47  ;;  %877 = vadd.xlane.f32.xlu0 %v876_v52 }
 0x2e6   :  { %v821_v42 = vpop.permute.xlu0 %820  ;;  %v823_v56 = vpop.permute.xlu1 %822 }
 0x2e7   :  { %v879_v1 = vsel %vm288_vm1, %v821_v42, 0.0  ;;  %v882_v2 = vsel %vm288_vm1, %v823_v56, 0.0 }
 0x2e8   :  { %880 = vadd.xlane.f32.xlu1 %v879_v1  ;;  %883 = vadd.xlane.f32.xlu0 %v882_v2 }
 0x2ea   :  { %v825_v3 = vpop.permute.xlu0 %824  ;;  %v827_v4 = vpop.permute.xlu1 %826 }
 0x2eb   :  { %v885_v6 = vsel %vm288_vm1, %v825_v3, 0.0  ;;  %v888_v7 = vsel %vm288_vm1, %v827_v4, 0.0 }
 0x2ec   :  { %886 = vadd.xlane.f32.xlu1 %v885_v6  ;;  %889 = vadd.xlane.f32.xlu0 %v888_v7 }
 0x2ee   :  { %v829_v48 = vpop.permute.xlu0 %828 }
 0x2ef   :  { %v891_v60 = vsel %vm288_vm1, %v829_v48, 0.0 }
 0x2f0   :  { %892 = vadd.xlane.f32.xlu1 %v891_v60 }
 0x35d   :  { %v854_v9 = vpop.xlane.xlu0 %853  ;;  %v848_v43 = vpop.xlane.xlu1 %847 }
 0x35e   :  { %v903_v10 = vadd.f32 %v1937_v62, %v854_v9  ;;  %v901_v45 = vadd.f32 %v1937_v62, %v848_v43 }
 0x360   :  { %v921_v13 = vmul.f32 1.442695, %v903_v10  ;;  %v917_v14 = vmul.f32 1.442695, %v901_v45 }
 0x361   :  { %v860_v15 = vpop.xlane.xlu0 %859 }
 0x362   :  { %1439 = vpow2.f32 %v921_v13  ;;  %v905_v50 = vadd.f32 %v1937_v62, %v860_v15 }
 0x363   :  { %1441 = vpow2.f32 %v917_v14 }
 0x364   :  { %v925_v59 = vmul.f32 1.442695, %v905_v50 }
 0x365   :  { %v866_v51 = vpop.xlane.xlu0 %865  ;;  %v857_v17 = vpop.xlane.xlu1 %856 }
 0x366   :  { %1443 = vpow2.f32 %v925_v59  ;;  %v907_v44 = vadd.f32 %v1937_v62, %v866_v51  ;;  %v904_v37 = vadd.f32 %v1937_v62, %v857_v17 }
 0x368   :  { %v929_v38 = vmul.f32 1.442695, %v907_v44  ;;  %v923_v39 = vmul.f32 1.442695, %v904_v37 }
 0x369   :  { %v872_v40 = vpop.xlane.xlu0 %871  ;;  %v863_v54 = vpop.xlane.xlu1 %862 }
 0x36a   :  { %1445 = vpow2.f32 %v929_v38  ;;  %v909_v41 = vadd.f32 %v1937_v62, %v872_v40  ;;  %v906_v36 = vadd.f32 %v1937_v62, %v863_v54 }
 0x36b   :  { %1447 = vpow2.f32 %v923_v39 }
 0x36c   :  { %v1440_v47 = vpop.eup %1439  ;;  %v933_v52 = vmul.f32 1.442695, %v909_v41  ;;  %v927_v42 = vmul.f32 1.442695, %v906_v36 }
 0x36d   :  { %v1442_v56 = vpop.eup %1441  ;;  %v851_v1 = vpop.xlane.xlu0 %850  ;;  %v951_v3 = vmul.f32 %v1440_v47, %v1616_v22 }
 0x36e   :  { %v869_v2 = vpop.xlane.xlu1 %868  ;;  %1449 = vpow2.f32 %v933_v52  ;;  %v902_v4 = vadd.f32 %v1937_v62, %v851_v1  ;;  %v949_v7 = vmul.f32 %v1442_v56, %v1605_v20 }
 0x36f   :  { %v908_v6 = vadd.f32 %v1937_v62, %v869_v2  ;;  %1451 = vpow2.f32 %v927_v42  ;;  %977 = vperm.xlu1 %1423, %v951_v3  }
 0x370   :  { %v1444_v48 = vpop.eup %1443  ;;  %v919_v60 = vmul.f32 1.442695, %v902_v4  ;;  %967 = vperm.xlu0 %1422, %v949_v7   ;;  %v1093_v4 = vsel %vm1091_vm3, %v951_v3, 0.0 }
 0x371   :  { %v931_v9 = vmul.f32 1.442695, %v908_v6  ;;  %v878_v43 = vpop.xlane.xlu0 %877  ;;  %v953_v45 = vmul.f32 %v1444_v48, %v1628_v24  ;;  %v1092_v6 = vsel %vm1091_vm3, %v949_v7, 0.0 }
 0x372   :  { %v875_v10 = vpop.xlane.xlu1 %874  ;;  %1453 = vpow2.f32 %v919_v60  ;;  %v911_v22 = vadd.f32 %v1937_v62, %v878_v43  ;;  %v1094_v3 = vadd.f32 %v1093_v4, %v1092_v6 }
 0x373   :  { %v910_v13 = vadd.f32 %v1937_v62, %v875_v10  ;;  %1455 = vpow2.f32 %v931_v9  ;;  %987 = vperm.xlu1 %1423, %v953_v45  }
 0x374   :  { %v1446_v14 = vpop.eup %1445  ;;  %v937_v15 = vmul.f32 1.442695, %v911_v22 }
 0x375   :  { %v935_v20 = vmul.f32 1.442695, %v910_v13  ;;  %v1448_v50 = vpop.eup %1447  ;;  %v884_v59 = vpop.xlane.xlu0 %883  ;;  %v955_v17 = vmul.f32 %v1446_v14, %v1640_v26 }
 0x376   :  { %v881_v51 = vpop.xlane.xlu1 %880  ;;  %1457 = vpow2.f32 %v937_v15  ;;  %v913_v44 = vadd.f32 %v1937_v62, %v884_v59  ;;  %v952_v37 = vmul.f32 %v1448_v50, %v1622_v23 }
 0x377   :  { %v912_v24 = vadd.f32 %v1937_v62, %v881_v51  ;;  %1459 = vpow2.f32 %v935_v20  ;;  %997 = vperm.xlu1 %1423, %v955_v17  }
 0x378   :  { %v1450_v38 = vpop.eup %1449  ;;  %v941_v39 = vmul.f32 1.442695, %v913_v44  ;;  %982 = vperm.xlu0 %1422, %v952_v37   ;;  %v1108_v43 = vsel %vm1091_vm3, %v952_v37, 0.0 }
 0x379   :  { %v939_v40 = vmul.f32 1.442695, %v912_v24  ;;  %v1452_v54 = vpop.eup %1451  ;;  %v890_v41 = vpop.xlane.xlu0 %889  ;;  %v957_v47 = vmul.f32 %v1450_v38, %v1652_v28 }
 0x37a   :  { %v887_v36 = vpop.xlane.xlu1 %886  ;;  %1461 = vpow2.f32 %v941_v39  ;;  %v915_v26 = vadd.f32 %v1937_v62, %v890_v41  ;;  %v954_v42 = vmul.f32 %v1452_v54, %v1634_v25  ;;  %v1095_v25 = vsel %vm1091_vm3, %v953_v45, 0.0 }
 0x37b   :  { %v914_v52 = vadd.f32 %v1937_v62, %v887_v36  ;;  %1463 = vpow2.f32 %v939_v40  ;;  %1007 = vperm.xlu1 %1423, %v957_v47   ;;  %v1096_v15 = vadd.f32 %v1095_v25, %v1094_v3  ;;  %v1099_v50 = vsel %vm1091_vm3, %v957_v47, 0.0 }
 0x37c   :  { %v1454_v23 = vpop.eup %1453  ;;  %v945_v56 = vmul.f32 1.442695, %v915_v26  ;;  %992 = vperm.xlu0 %1422, %v954_v42  }
 0x37d   :  { %v943_v1 = vmul.f32 1.442695, %v914_v52  ;;  %v1456_v2 = vpop.eup %1455  ;;  %v950_v28 = vmul.f32 %v1454_v23, %v1611_v21  ;;  %v1097_v21 = vsel %vm1091_vm3, %v955_v17, 0.0 }
 0x37e   :  { %v893_v48 = vpop.xlane.xlu1 %892  ;;  %1465 = vpow2.f32 %v945_v56  ;;  %v956_v9 = vmul.f32 %v1456_v2, %v1646_v27  ;;  %v1098_v44 = vadd.f32 %v1097_v21, %v1096_v15 }
 0x37f   :  { %v916_v60 = vadd.f32 %v1937_v62, %v893_v48  ;;  %1467 = vpow2.f32 %v943_v1  ;;  %972 = vperm.xlu1 %1423, %v950_v28   ;;  %v1107_v10 = vsel %vm1091_vm3, %v950_v28, 0.0  ;;  %v1110_v62 = vsel %vm1091_vm3, %v954_v42, 0.0 }
 0x380   :  { %v1458_v22 = vpop.eup %1457  ;;  %v1109_v7 = vadd.f32 %v1108_v43, %v1107_v10  ;;  %1002 = vperm.xlu0 %1422, %v956_v9   ;;  %v1112_v59 = vsel %vm1091_vm3, %v956_v9, 0.0  ;;  %v1100_v39 = vadd.f32 %v1099_v50, %v1098_v44  ;;  %v1141_v10 = vld [vmem:[%s2054_s10 + $0x18] sm:$0xff] }
 0x381   :  { %v947_v13 = vmul.f32 1.442695, %v916_v60  ;;  %v1460_v14 = vpop.eup %1459  ;;  %v959_v27 = vmul.f32 %v1458_v22, %v1664_v30  ;;  %v1138_v30 = vld [vmem:[%s2054_s10] sm:$0xff] }
 0x382   :  { %v1111_v45 = vadd.f32 %v1110_v62, %v1109_v7  ;;  %v958_v20 = vmul.f32 %v1460_v14, %v1658_v29  ;;  %v1139_v29 = vld [vmem:[%s2054_s10 + $0x8] sm:$0xff] }
 0x383   :  { %1469 = vpow2.f32 %v947_v13  ;;  %1017 = vperm.xlu1 %1423, %v959_v27   ;;  %v1101_v17 = vsel %vm1091_vm3, %v959_v27, 0.0  ;;  %v1409_v54 = vpack.c.bf16 %v1139_v29, %v1138_v30 }
 0x384   :  { %v1462_v51 = vpop.eup %1461  ;;  %v1113_v24 = vadd.f32 %v1112_v59, %v1111_v45  ;;  %1012 = vperm.xlu0 %1422, %v958_v20   ;;  %v1114_v41 = vsel %vm1091_vm3, %v958_v20, 0.0  ;;  %v1102_v26 = vadd.f32 %v1101_v17, %v1100_v39 }
 0x385   :  { %v1464_v37 = vpop.eup %1463  ;;  %v961_v38 = vmul.f32 %v1462_v51, %v1676_v32  ;;  %1410 = vmatprep.subr.bf16.mxu0 %v1409_v54 }
 0x386   :  { %v960_v40 = vmul.f32 %v1464_v37, %v1670_v31  ;;  %v1115_v32 = vadd.f32 %v1114_v41, %v1113_v24  ;;  %1412 = vmatpush3.bf16.msra.mxu0 %v1409_v54 }
 0x387   :  { %1027 = vperm.xlu1 %1423, %v961_v38   ;;  %v1103_v36 = vsel %vm1091_vm3, %v961_v38, 0.0 }
 0x388   :  { %v1466_v47 = vpop.eup %1465  ;;  %1022 = vperm.xlu0 %1422, %v960_v40   ;;  %v1116_v42 = vsel %vm1091_vm3, %v960_v40, 0.0  ;;  %v1104_v56 = vadd.f32 %v1103_v36, %v1102_v26 }
 0x389   :  { %v1468_v52 = vpop.eup %1467  ;;  %v963_v23 = vmul.f32 %v1466_v47, %v1688_v34  ;;  %v1117_v4 = vadd.f32 %v1116_v42, %v1115_v32 }
 0x38a   :  { %v962_v31 = vmul.f32 %v1468_v52, %v1682_v33  ;;  %v1140_v33 = vld [vmem:[%s2054_s10 + $0x10] sm:$0xff] }
 0x38b   :  { %1037 = vperm.xlu1 %1423, %v963_v23   ;;  %v1105_v1 = vsel %vm1091_vm3, %v963_v23, 0.0  ;;  %v1413_v22 = vpack.c.bf16 %v1141_v10, %v1140_v33 }
 0x38c   :  { %v1106_v6 = vadd.f32 %v1105_v1, %v1104_v56  ;;  %1032 = vperm.xlu0 %1422, %v962_v31   ;;  %v1118_v48 = vsel %vm1091_vm3, %v962_v31, 0.0 }
 0x38d   :  { %v1470_v2 = vpop.eup %1469  ;;  %v1119_v9 = vadd.f32 %v1118_v48, %v1117_v4  ;;  %1414 = vmatprep.subr.bf16.mxu0 %v1413_v22 }
 0x38e   :  { %v964_v28 = vmul.f32 %v1470_v2, %v1694_v35  ;;  %v1122_v60 = vadd.f32 1e-10, %v1106_v6  ;;  %1416 = vmatpush3.bf16.msra.mxu0 %v1413_v22 }
 0x390   :  { %v1120_v25 = vsel %vm1091_vm3, %v964_v28, 0.0  ;;  %1471 = vrcp.f32 %v1122_v60  ;;  %1042 = vperm.xlu0 %1422, %v964_v28  }
 0x391   :  { %v1121_v34 = vadd.f32 %v1120_v25, %v1119_v9 }
 0x393   :  { %v1123_v43 = vadd.f32 1e-10, %v1121_v34 }
 0x395   :  { %1473 = vrcp.f32 %v1123_v43 }
 0x39a   :  { %v1472_v35 = vpop.eup %1471 }
 0x39b   :  { %1128 = vperm.xlu1 %1423, %v1472_v35  }
 0x39f   :  { %v1474_v3 = vpop.eup %1473 }
 0x3a0   :  { %1133 = vperm.xlu0 %1422, %v1474_v3  }
 0x3ee   :  { %v978_v13 = vpop.permute.xlu1 %977 }
 0x3ef   :  { %v968_v14 = vpop.permute.xlu0 %967  ;;  %v1047_v37 = vmul.f32 %v978_v13, %v1812_v0 }
 0x3f0   :  { %v1045_v24 = vmul.f32 %v968_v14, %v1808_v63 }
 0x3f1   :  { %v1062_v41 = vsel %vm288_vm1, %v1047_v37, 0.0 }
 0x3f2   :  { %v988_v7 = vpop.permute.xlu1 %987 }
 0x3f3   :  { %v1049_v30 = vmul.f32 %v988_v7, %v1818_v5 }
 0x3f5   :  { %v1064_v63 = vsel %vm288_vm1, %v1049_v30, 0.0 }
 0x3f6   :  { %v998_v21 = vpop.permute.xlu1 %997 }
 0x3f7   :  { %v983_v62 = vpop.permute.xlu0 %982 }
 0x3f8   :  { %v1048_v44 = vmul.f32 %v983_v62, %v1829_v12  ;;  %v1051_v12 = vmul.f32 %v998_v21, %v1833_v18 }
 0x3fa   :  { %v1008_v27 = vpop.permute.xlu1 %1007  ;;  %v1077_v29 = vsel %vm288_vm1, %v1048_v44, 0.0 }
 0x3fb   :  { %v993_v15 = vpop.permute.xlu0 %992  ;;  %v1053_v36 = vmul.f32 %v1008_v27, %v1825_v11 }
 0x3fc   :  { %v1050_v39 = vmul.f32 %v993_v15, %v1847_v19  ;;  %v1066_v19 = vsel %vm288_vm1, %v1051_v12, 0.0 }
 0x3fd   :  { %v1068_v56 = vsel %vm288_vm1, %v1053_v36, 0.0 }
 0x3fe   :  { %v973_v45 = vpop.permute.xlu1 %972  ;;  %v1079_v0 = vsel %vm288_vm1, %v1050_v39, 0.0 }
 0x3ff   :  { %v1003_v20 = vpop.permute.xlu0 %1002  ;;  %v1046_v50 = vmul.f32 %v973_v45, %v1843_v49  ;;  %v1061_v49 = vsel %vm288_vm1, %v1045_v24, 0.0 }
 0x400   :  { %v1052_v5 = vmul.f32 %v1003_v20, %v1856_v53  ;;  %v1063_v47 = vadd.f32 %v1062_v41, %v1061_v49 }
 0x401   :  { %v1076_v17 = vsel %vm288_vm1, %v1046_v50, 0.0 }
 0x402   :  { %v1018_v51 = vpop.permute.xlu1 %1017  ;;  %v1078_v40 = vadd.f32 %v1077_v29, %v1076_v17  ;;  %v1065_v42 = vadd.f32 %v1064_v63, %v1063_v47  ;;  %v1081_v18 = vsel %vm288_vm1, %v1052_v5, 0.0 }
 0x403   :  { %v1013_v59 = vpop.permute.xlu0 %1012  ;;  %v1055_v52 = vmul.f32 %v1018_v51, %v1860_v46 }
 0x404   :  { %v1080_v26 = vadd.f32 %v1079_v0, %v1078_v40  ;;  %v1054_v31 = vmul.f32 %v1013_v59, %v1870_v55  ;;  %v1067_v11 = vadd.f32 %v1066_v19, %v1065_v42 }
 0x405   :  { %v1070_v53 = vsel %vm288_vm1, %v1055_v52, 0.0 }
 0x406   :  { %v1028_v54 = vpop.permute.xlu1 %1027  ;;  %v1082_v2 = vadd.f32 %v1081_v18, %v1080_v26  ;;  %v1069_v48 = vadd.f32 %v1068_v56, %v1067_v11  ;;  %v1083_v28 = vsel %vm288_vm1, %v1054_v31, 0.0 }
 0x407   :  { %v1023_v38 = vpop.permute.xlu0 %1022  ;;  %v1057_v1 = vmul.f32 %v1028_v54, %v1874_v8 }
 0x408   :  { %v1056_v4 = vmul.f32 %v1023_v38, %v1884_v58  ;;  %v1084_v25 = vadd.f32 %v1083_v28, %v1082_v2  ;;  %v1071_v55 = vadd.f32 %v1070_v53, %v1069_v48 }
 0x409   :  { %v1072_v60 = vsel %vm288_vm1, %v1057_v1, 0.0 }
 0x40a   :  { %v1038_v23 = vpop.permute.xlu1 %1037  ;;  %v1085_v8 = vsel %vm288_vm1, %v1056_v4, 0.0  ;;  %v1073_v33 = vadd.f32 %v1072_v60, %v1071_v55 }
 0x40b   :  { %v1033_v32 = vpop.permute.xlu0 %1032  ;;  %v1059_v6 = vmul.f32 %v1038_v23, %v1888_v16  ;;  %v1086_v16 = vadd.f32 %v1085_v8, %v1084_v25 }
 0x40c   :  { %v1058_v9 = vmul.f32 %v1033_v32, %v1898_v61 }
 0x40d   :  { %v1074_v34 = vsel %vm288_vm1, %v1059_v6, 0.0 }
 0x40e   :  { %v1087_v58 = vsel %vm288_vm1, %v1058_v9, 0.0  ;;  %v1075_v10 = vadd.f32 %v1074_v34, %v1073_v33 }
 0x40f   :  { %v1043_v46 = vpop.permute.xlu0 %1042  ;;  %v1088_v3 = vadd.f32 %v1087_v58, %v1086_v16 }
 0x410   :  { %v1060_v43 = vmul.f32 %v1043_v46, %v1910_v57  ;;  %v1282_v57 = vld [vmem:[%s2055_s11] ss:$0 sm:$0xff] }
 0x412   :  { %v1089_v22 = vsel %vm288_vm1, %v1060_v43, 0.0 }
 0x413   :  { %v1090_v61 = vadd.f32 %v1089_v22, %v1088_v3 }
 0x41a   :  { %v1129_v35 = vpop.permute.xlu1 %1128 }
 0x41b   :  { %v1136_v13 = vmul.f32 %v1129_v35, %v1075_v10 }
 0x41d   :  { %1398 = vmatprep.mubr.msk.f32.mxu0 %vm288_vm1, %v1136_v13 }
 0x41f   :  { %v1134_v7 = vpop.permute.xlu0 %1133 }
 0x420   :  { %v1137_v14 = vmul.f32 %v1134_v7, %v1090_v61 }
 0x422   :  { %1399 = vmatmul.mubr.msk.f32.vlgmr.msra.gmra.mrb[16].mxu0 %vm288_vm1, %v1137_v14 }
 0x4f5   :  { %v1400_v21 = vpop.f32.mrb[16].mxu0 }
 0x4f6   :  { %v1227_v62 = vadd.f32 %v1400_v21, %v1282_v57  ;;  %v1221_v27 = vpop.f32.mrb[17].mxu0 }
 0x4f7   :  { %v1222_v15 = vadd.f32 %v1282_v57, %v1221_v27 }
 0x4f8   :  { %v1231_v45 = vmax.f32 %v1227_v62, 0.0 }
 0x4f9   :  { %v1230_v20 = vmax.f32 %v1222_v15, 0.0 }
 0x4fa   :  { %1233 = vst.msk [vmem:[%s2056_s12 + $0x8] sm:$0xff] %vm288_vm1, %v1231_v45 }
 0x4fb   :  { %1232 = vst.msk [vmem:[%s2056_s12] sm:$0xff] %vm288_vm1, %v1230_v20 }

// kernel: run.6
= control target key start
LH: loop header
LB: loop body
LE: loop exit
PB: predicated region body
PF: predicated region fallthrough
CT: control target
= control target key end

     0   :  { %vm94_vm0 = vcmask 261120   ;;  %vm460_vm1 = vcmask 7168   ;;  %s927_s4 = inlined_call_operand.vmem [shape: bf16[32,32], index: 4, kind: input, shape index: {}]   ;;  %s928_s3 = inlined_call_operand.vmem [shape: bf16[32,32], index: 3, kind: input, shape index: {}]   ;;  %s929_s1 = inlined_call_operand.vmem [shape: bf16[4,16,32], index: 1, kind: input, shape index: {}]   ;;  %s930_s0 = inlined_call_operand.vmem [shape: bf16[4,16,32], index: 0, kind: input, shape index: {}]   ;;  %s931_s7 = inlined_call_operand.<no memory space> [shape: f32[1,1], index: 7, kind: input, shape index: {}]   ;;  %s932_s5 = inlined_call_operand.vmem [shape: f32[1,32], index: 5, kind: input, shape index: {}]   ;;  %s933_s6 = inlined_call_operand.vmem [shape: f32[1,32], index: 6, kind: input, shape index: {}]   ;;  %s934_s2 = inlined_call_operand.vmem [shape: f32[4,16,1], index: 2, kind: input, shape index: {}]   ;;  %s935_s8 = inlined_call_operand.vmem [shape: f32[32,32], index: 8, kind: input, shape index: {}]   ;;  %s936_s9 = inlined_call_operand.vmem [shape: f32[1,32], index: 9, kind: input, shape index: {}]   ;;  %s937_s10 = inlined_call_operand.vmem [shape: f32[16,32], index: 10, kind: output, shape index: {}]  }
   0x1   :  { %v689_v0 = vld [vmem:[%s927_s4] sm:$0xff]   ;;  %v691_v2 = vld [vmem:[%s927_s4 + $0x8] sm:$0xff]   ;;  %v697_v8 = vld [vmem:[%s929_s1 + $0x10] sm:$0xff]   ;;  %v15_v12 = vstv %s931_s7 }
   0x2   :  { %v690_v1 = vld [vmem:[%s928_s3] sm:$0xff]   ;;  %635 = vmatprep.subr.bf16.mxu1 %v689_v0  ;;  %v692_v3 = vld [vmem:[%s928_s3 + $0x8] sm:$0xff]   ;;  %v816_v9 = vld [vmem:[%s930_s0 + $0x10] sm:$0xff]   ;;  %16 = vst [vmem:[#allocation2] sm:$0x1] %v15_v12 }
   0x3   :  { %647 = vmatprep.subr.bf16.mxu0 %v690_v1  ;;  %636 = vmatpush3.bf16.msra.mxu1 %v689_v0  ;;  %v693_v4 = vld [vmem:[%s929_s1] sm:$0xff]   ;;  %v695_v6 = vld [vmem:[%s929_s1 + $0x8] sm:$0xff]   ;;  %v829_v10 = vld [vmem:[%s930_s0 + $0x18] sm:$0xff]  }
   0x4   :  { %648 = vmatpush3.bf16.msra.mxu0 %v690_v1  ;;  %637 = vmatprep.subr.bf16.mxu1 %v691_v2  ;;  %v799_v5 = vld [vmem:[%s930_s0] sm:$0xff]   ;;  %v808_v7 = vld [vmem:[%s930_s0 + $0x8] sm:$0xff]   ;;  %v699_v11 = vld [vmem:[%s929_s1 + $0x18] sm:$0xff]  }
   0x5   :  { %649 = vmatprep.subr.bf16.mxu0 %v692_v3  ;;  %639 = vmatprep.mubr.msk.bf16.mxu1 %vm94_vm0, %v693_v4  ;;  %v611_v15 = vld [vmem:[%s932_s5] ss:$0 sm:$0xff] }
   0x6   :  { %651 = vmatprep.mubr.msk.bf16.mxu0 %vm94_vm0, %v799_v5  ;;  %v612_v28 = vld [vmem:[%s933_s6] ss:$0 sm:$0xff] }
   0x7   :  { %638 = vmatpush3.bf16.msra.mxu1 %v691_v2 }
   0x8   :  { %650 = vmatpush3.bf16.msra.mxu0 %v692_v3 }
   0x9   :  { %v613_v12 = vld [vmem:[#allocation2] ss:$0 sm:$0xff] }
   0xa   :  { %640 = vmatmul.mubr.msk.bf16.vlgmr.msra.gmra.mrb[0].mxu1 %vm94_vm0, %v695_v6 }
   0xb   :  { %652 = vmatmul.mubr.msk.bf16.vlgmr.msra.gmra.mrb[0].mxu0 %vm94_vm0, %v808_v7  ;;  %643 = vmatprep.mubr.msk.bf16.mxu1 %vm94_vm0, %v697_v8 }
   0xc   :  { %655 = vmatprep.mubr.msk.bf16.mxu0 %vm94_vm0, %v816_v9 }
  0x12   :  { %644 = vmatmul.mubr.msk.bf16.gmra.mrb[4].mxu1 %vm94_vm0, %v699_v11  ;;  %v725_v11 = vmov 0  }
  0x13   :  { %656 = vmatmul.mubr.msk.bf16.gmra.mrb[4].mxu0 %vm94_vm0, %v829_v10  ;;  %688 = vset.pattern.permute.xlu1 %v725_v11 }
  0x14   :  { %687 = vset.pattern.permute.xlu0 %v725_v11 }
  0xdd   :  { %v641_v13 = vpop.f32.mrb[0].mxu1 }
  0xde   :  { %v653_v14 = vpop.f32.mrb[0].mxu0  ;;  %v141_v16 = vpop.f32.mrb[1].mxu1 }
  0xdf   :  { %v259_v17 = vadd.f32 %v653_v14, %v641_v13  ;;  %v250_v18 = vpop.f32.mrb[1].mxu0  ;;  %v642_v19 = vpop.f32.mrb[2].mxu1 }
  0xe0   :  { %v251_v20 = vadd.f32 %v250_v18, %v141_v16  ;;  %v654_v21 = vpop.f32.mrb[2].mxu0  ;;  %v144_v22 = vpop.f32.mrb[3].mxu1 }
  0xe1   :  { %v290_v23 = vadd.f32 %v611_v15, %v259_v17  ;;  %v262_v24 = vadd.f32 %v654_v21, %v642_v19  ;;  %v253_v25 = vpop.f32.mrb[3].mxu0 }
  0xe2   :  { %v288_v26 = vadd.f32 %v611_v15, %v251_v20  ;;  %v254_v27 = vadd.f32 %v253_v25, %v144_v22 }
  0xe3   :  { %v298_v29 = vmax.f32 %v290_v23, 0.0  ;;  %v291_v30 = vadd.f32 %v611_v15, %v262_v24 }
  0xe4   :  { %v296_v31 = vmax.f32 %v288_v26, 0.0  ;;  %v289_v32 = vadd.f32 %v611_v15, %v254_v27 }
  0xe5   :  { %v299_v33 = vmax.f32 %v291_v30, 0.0  ;;  %v645_v34 = vpop.f32.mrb[4].mxu1  ;;  %v313_v35 = vmul.f32 %v612_v28, %v298_v29 }
  0xe6   :  { %v297_v36 = vmax.f32 %v289_v32, 0.0  ;;  %v657_v37 = vpop.f32.mrb[4].mxu0  ;;  %v157_v38 = vpop.f32.mrb[5].mxu1  ;;  %v311_v44 = vmul.f32 %v612_v28, %v296_v31  ;;  %v360_v31 = vld [vmem:[%s934_s2 + $0x10] sm:$0xff] }
  0xe7   :  { %v275_v39 = vadd.f32 %v657_v37, %v645_v34  ;;  %v266_v40 = vpop.f32.mrb[5].mxu0  ;;  %v646_v41 = vpop.f32.mrb[6].mxu1  ;;  %v325_v42 = vsel %vm94_vm0, %v313_v35, 0.0  ;;  %v314_v43 = vmul.f32 %v612_v28, %v299_v33 }
  0xe8   :  { %v267_v45 = vadd.f32 %v266_v40, %v157_v38  ;;  %326 = vadd.xlane.f32.xlu0 %v325_v42  ;;  %v658_v46 = vpop.f32.mrb[6].mxu0  ;;  %v160_v47 = vpop.f32.mrb[7].mxu1  ;;  %v312_v52 = vmul.f32 %v612_v28, %v297_v36  ;;  %v319_v56 = vsel %vm94_vm0, %v311_v44, 0.0  ;;  %v361_v40 = vld [vmem:[%s934_s2 + $0x18] sm:$0xff] }
  0xe9   :  { %v294_v48 = vadd.f32 %v611_v15, %v275_v39  ;;  %v278_v49 = vadd.f32 %v658_v46, %v646_v41  ;;  %v269_v50 = vpop.f32.mrb[7].mxu0  ;;  %v328_v51 = vsel %vm94_vm0, %v314_v43, 0.0  ;;  %v358_v41 = vld [vmem:[%s934_s2] sm:$0xff]  ;;  %v359_v46 = vld [vmem:[%s934_s2 + $0x8] sm:$0xff] }
  0xea   :  { %v292_v53 = vadd.f32 %v611_v15, %v267_v45  ;;  %v270_v54 = vadd.f32 %v269_v50, %v160_v47  ;;  %329 = vadd.xlane.f32.xlu1 %v328_v51  ;;  %v322_v60 = vsel %vm94_vm0, %v312_v52, 0.0  ;;  %v363_v51 = vld [vmem:[%s934_s2 + $0x28] sm:$0xff] }
  0xeb   :  { %v295_v55 = vadd.f32 %v611_v15, %v278_v49  ;;  %v302_v57 = vmax.f32 %v294_v48, 0.0  ;;  %v362_v48 = vld [vmem:[%s934_s2 + $0x20] sm:$0xff] }
  0xec   :  { %v300_v58 = vmax.f32 %v292_v53, 0.0  ;;  %v293_v59 = vadd.f32 %v611_v15, %v270_v54  ;;  %320 = vadd.xlane.f32.xlu0 %v319_v56 }
  0xed   :  { %v303_v61 = vmax.f32 %v295_v55, 0.0  ;;  %v317_v2 = vmul.f32 %v612_v28, %v302_v57  ;;  %v364_v55 = vld [vmem:[%s934_s2 + $0x30] sm:$0xff] }
  0xee   :  { %v301_v62 = vmax.f32 %v293_v59, 0.0  ;;  %323 = vadd.xlane.f32.xlu1 %v322_v60  ;;  %v315_v63 = vmul.f32 %v612_v28, %v300_v58 }
  0xef   :  { %v318_v4 = vmul.f32 %v612_v28, %v303_v61  ;;  %v337_v6 = vsel %vm94_vm0, %v317_v2, 0.0 }
  0xf0   :  { %v331_v0 = vsel %vm94_vm0, %v315_v63, 0.0  ;;  %v316_v1 = vmul.f32 %v612_v28, %v301_v62  ;;  %v365_v62 = vld [vmem:[%s934_s2 + $0x38] sm:$0xff] }
  0xf1   :  { %332 = vadd.xlane.f32.xlu0 %v331_v0  ;;  %v340_v8 = vsel %vm94_vm0, %v318_v4, 0.0 }
  0xf2   :  { %v334_v3 = vsel %vm94_vm0, %v316_v1, 0.0 }
  0xf3   :  { %335 = vadd.xlane.f32.xlu1 %v334_v3 }
  0xf5   :  { %338 = vadd.xlane.f32.xlu0 %v337_v6 }
  0xf7   :  { %341 = vadd.xlane.f32.xlu1 %v340_v8 }
 0x175   :  { %v327_v13 = vpop.xlane.xlu0 %326 }
 0x176   :  { %v352_v14 = vadd.f32 %v613_v12, %v327_v13 }
 0x177   :  { %v330_v15 = vpop.xlane.xlu1 %329 }
 0x178   :  { %v370_v16 = vmul.f32 1.442695, %v352_v14  ;;  %v353_v17 = vadd.f32 %v613_v12, %v330_v15 }
 0x179   :  { %v321_v18 = vpop.xlane.xlu0 %320 }
 0x17a   :  { %705 = vpow2.f32 %v370_v16  ;;  %v372_v19 = vmul.f32 1.442695, %v353_v17  ;;  %v350_v20 = vadd.f32 %v613_v12, %v321_v18  ;;  %v491_v16 = vld [vmem:[%s935_s8] sm:$0xff]  ;;  %v492_v17 = vld [vmem:[%s935_s8 + $0x8] sm:$0xff] }
 0x17b   :  { %v324_v21 = vpop.xlane.xlu1 %323  ;;  %v670_v18 = vpack.c.bf16 %v492_v17, %v491_v16 }
 0x17c   :  { %707 = vpow2.f32 %v372_v19  ;;  %v366_v22 = vmul.f32 1.442695, %v350_v20  ;;  %v351_v23 = vadd.f32 %v613_v12, %v324_v21  ;;  %v493_v20 = vld [vmem:[%s935_s8 + $0x10] sm:$0xff]  ;;  %v494_v21 = vld [vmem:[%s935_s8 + $0x18] sm:$0xff] }
 0x17d   :  { %671 = vmatprep.subr.bf16.mxu1 %v670_v18 }
 0x17e   :  { %709 = vpow2.f32 %v366_v22  ;;  %v368_v24 = vmul.f32 1.442695, %v351_v23  ;;  %v333_v25 = vpop.xlane.xlu0 %332  ;;  %673 = vmatpush3.bf16.msra.mxu1 %v670_v18  ;;  %v674_v22 = vpack.c.bf16 %v494_v21, %v493_v20 }
 0x17f   :  { %v354_v26 = vadd.f32 %v613_v12, %v333_v25 }
 0x180   :  { %711 = vpow2.f32 %v368_v24  ;;  %v336_v27 = vpop.xlane.xlu1 %335  ;;  %675 = vmatprep.subr.bf16.mxu1 %v674_v22 }
 0x181   :  { %v374_v28 = vmul.f32 1.442695, %v354_v26  ;;  %v355_v29 = vadd.f32 %v613_v12, %v336_v27 }
 0x182   :  { %v339_v30 = vpop.xlane.xlu0 %338  ;;  %677 = vmatpush3.bf16.msra.mxu1 %v674_v22 }
 0x183   :  { %713 = vpow2.f32 %v374_v28  ;;  %v376_v32 = vmul.f32 1.442695, %v355_v29  ;;  %v356_v33 = vadd.f32 %v613_v12, %v339_v30  ;;  %v390_v28 = vunpack.c.l.bf16 %v799_v5 }
 0x184   :  { %v706_v34 = vpop.eup %705  ;;  %v342_v35 = vpop.xlane.xlu1 %341  ;;  %v392_v30 = vunpack.c.l.bf16 %v808_v7 }
 0x185   :  { %715 = vpow2.f32 %v376_v32  ;;  %v378_v36 = vmul.f32 1.442695, %v356_v33  ;;  %v357_v37 = vadd.f32 %v613_v12, %v342_v35  ;;  %v384_v38 = vmul.f32 %v706_v34, %v360_v31 }
 0x186   :  { %v708_v39 = vpop.eup %707  ;;  %v391_v32 = vunpack.c.h.bf16 %v799_v5  ;;  %v394_v33 = vunpack.c.l.bf16 %v816_v9  ;;  %v393_v35 = vunpack.c.h.bf16 %v808_v7 }
 0x187   :  { %717 = vpow2.f32 %v378_v36  ;;  %v380_v42 = vmul.f32 1.442695, %v357_v37  ;;  %410 = vperm.xlu1 %688, %v384_v38   ;;  %v385_v44 = vmul.f32 %v708_v39, %v361_v40  ;;  %v462_v56 = vsel %vm460_vm1, %v384_v38, 0.0 }
 0x188   :  { %v710_v43 = vpop.eup %709  ;;  %v395_v40 = vunpack.c.h.bf16 %v816_v9 }
 0x189   :  { %719 = vpow2.f32 %v380_v42  ;;  %v382_v45 = vmul.f32 %v710_v43, %v358_v41  ;;  %v469_v63 = vsel %vm460_vm1, %v385_v44, 0.0  ;;  %v396_v42 = vunpack.c.l.bf16 %v829_v10 }
 0x18a   :  { %v712_v47 = vpop.eup %711 }
 0x18b   :  { %415 = vperm.xlu1 %688, %v385_v44   ;;  %400 = vperm.xlu0 %687, %v382_v45   ;;  %v383_v49 = vmul.f32 %v712_v47, %v359_v46  ;;  %v461_v52 = vsel %vm460_vm1, %v382_v45, 0.0 }
 0x18c   :  { %v463_v61 = vadd.f32 %v462_v56, %v461_v52 }
 0x18d   :  { %v714_v50 = vpop.eup %713  ;;  %v468_v57 = vsel %vm460_vm1, %v383_v49, 0.0 }
 0x18e   :  { %v386_v53 = vmul.f32 %v714_v50, %v362_v48  ;;  %v470_v3 = vadd.f32 %v469_v63, %v468_v57  ;;  %v397_v48 = vunpack.c.h.bf16 %v829_v10  ;;  %v614_v63 = vld [vmem:[%s936_s9] ss:$0 sm:$0xff] }
 0x18f   :  { %v716_v54 = vpop.eup %715  ;;  %405 = vperm.xlu1 %688, %v383_v49  }
 0x190   :  { %v464_v58 = vsel %vm460_vm1, %v386_v53, 0.0  ;;  %v387_v59 = vmul.f32 %v716_v54, %v363_v51 }
 0x191   :  { %v718_v60 = vpop.eup %717  ;;  %v465_v4 = vadd.f32 %v464_v58, %v463_v61 }
 0x192   :  { %v388_v0 = vmul.f32 %v718_v60, %v364_v55  ;;  %v471_v1 = vsel %vm460_vm1, %v387_v59, 0.0 }
 0x193   :  { %v720_v2 = vpop.eup %719  ;;  %v472_v12 = vadd.f32 %v471_v1, %v470_v3 }
 0x194   :  { %430 = vperm.xlu1 %688, %v388_v0   ;;  %v466_v6 = vsel %vm460_vm1, %v388_v0, 0.0  ;;  %v389_v8 = vmul.f32 %v720_v2, %v365_v62 }
 0x195   :  { %v467_v11 = vadd.f32 %v466_v6, %v465_v4 }
 0x196   :  { %v473_v13 = vsel %vm460_vm1, %v389_v8, 0.0 }
 0x197   :  { %v475_v14 = vadd.f32 1e-10, %v467_v11  ;;  %v474_v15 = vadd.f32 %v473_v13, %v472_v12 }
 0x198   :  { %420 = vperm.xlu1 %688, %v386_v53  }
 0x199   :  { %721 = vrcp.f32 %v475_v14  ;;  %v476_v19 = vadd.f32 1e-10, %v474_v15 }
 0x19b   :  { %723 = vrcp.f32 %v476_v19 }
 0x19c   :  { %425 = vperm.xlu1 %688, %v387_v59  }
 0x1a0   :  { %435 = vperm.xlu1 %688, %v389_v8  }
 0x1a3   :  { %v722_v23 = vpop.eup %721 }
 0x1a4   :  { %481 = vperm.xlu1 %688, %v722_v23  }
 0x1a5   :  { %v724_v24 = vpop.eup %723 }
 0x1a6   :  { %486 = vperm.xlu0 %687, %v724_v24  }
 0x206   :  { %v411_v25 = vpop.permute.xlu1 %410 }
 0x207   :  { %v440_v36 = vmul.f32 %v411_v25, %v392_v30 }
 0x209   :  { %v447_v44 = vsel %vm94_vm0, %v440_v36, 0.0 }
 0x20a   :  { %v416_v26 = vpop.permute.xlu1 %415  ;;  %v401_v29 = vpop.permute.xlu0 %400 }
 0x20b   :  { %v438_v34 = vmul.f32 %v401_v29, %v390_v28  ;;  %v441_v43 = vmul.f32 %v416_v26, %v393_v35 }
 0x20d   :  { %v446_v41 = vsel %vm94_vm0, %v438_v34, 0.0  ;;  %v454_v50 = vsel %vm94_vm0, %v441_v43, 0.0 }
 0x20e   :  { %v406_v27 = vpop.permute.xlu1 %405  ;;  %v448_v46 = vadd.f32 %v447_v44, %v446_v41 }
 0x20f   :  { %v439_v38 = vmul.f32 %v406_v27, %v391_v32 }
 0x211   :  { %v453_v47 = vsel %vm94_vm0, %v439_v38, 0.0 }
 0x212   :  { %v455_v52 = vadd.f32 %v454_v50, %v453_v47 }
 0x213   :  { %v431_v31 = vpop.permute.xlu1 %430 }
 0x214   :  { %v444_v49 = vmul.f32 %v431_v31, %v396_v42 }
 0x216   :  { %v451_v55 = vsel %vm94_vm0, %v444_v49, 0.0 }
 0x217   :  { %v421_v37 = vpop.permute.xlu1 %420 }
 0x218   :  { %v442_v39 = vmul.f32 %v421_v37, %v394_v33 }
 0x21a   :  { %v449_v5 = vsel %vm94_vm0, %v442_v39, 0.0 }
 0x21b   :  { %v426_v45 = vpop.permute.xlu1 %425  ;;  %v450_v9 = vadd.f32 %v449_v5, %v448_v46 }
 0x21c   :  { %v443_v7 = vmul.f32 %v426_v45, %v395_v40 }
 0x21d   :  { %v452_v58 = vadd.f32 %v451_v55, %v450_v9 }
 0x21e   :  { %v456_v51 = vsel %vm94_vm0, %v443_v7, 0.0 }
 0x21f   :  { %v436_v53 = vpop.permute.xlu1 %435  ;;  %v457_v56 = vadd.f32 %v456_v51, %v455_v52 }
 0x220   :  { %v445_v54 = vmul.f32 %v436_v53, %v397_v48 }
 0x222   :  { %v458_v57 = vsel %vm94_vm0, %v445_v54, 0.0 }
 0x223   :  { %v482_v59 = vpop.permute.xlu1 %481  ;;  %v459_v60 = vadd.f32 %v458_v57, %v457_v56 }
 0x224   :  { %v489_v61 = vmul.f32 %v482_v59, %v452_v58 }
 0x225   :  { %v487_v62 = vpop.permute.xlu0 %486 }
 0x226   :  { %v490_v10 = vmul.f32 %v487_v62, %v459_v60  ;;  %667 = vmatprep.mubr.msk.f32.mxu1 %vm94_vm0, %v489_v61 }
 0x228   :  { %668 = vmatmul.mubr.msk.f32.vlgmr.msra.gmra.mrb[8].mxu1 %vm94_vm0, %v490_v10 }
 0x2fb   :  { %v669_v0 = vpop.f32.mrb[8].mxu1 }
 0x2fc   :  { %v580_v1 = vadd.f32 %v669_v0, %v614_v63  ;;  %v574_v2 = vpop.f32.mrb[9].mxu1 }
 0x2fd   :  { %v575_v3 = vadd.f32 %v614_v63, %v574_v2 }
 0x2fe   :  { %v584_v4 = vmax.f32 %v580_v1, 0.0 }
 0x2ff   :  { %v583_v6 = vmax.f32 %v575_v3, 0.0 }
 0x300   :  { %586 = vst.msk [vmem:[%s937_s10 + $0x8] sm:$0xff] %vm94_vm0, %v584_v4 }
 0x301   :  { %585 = vst.msk [vmem:[%s937_s10] sm:$0xff] %vm94_vm0, %v583_v6 }

// kernel: run.7
= control target key start
LH: loop header
LB: loop body
LE: loop exit
PB: predicated region body
PF: predicated region fallthrough
CT: control target
= control target key end

     0   :  { %vm70_vm0 = vcmask 261120   ;;  %vm733_vm1 = vcmask 7168   ;;  %s1175_s4 = inlined_call_operand.vmem [shape: f32[32,32], index: 4, kind: input, shape index: {}]   ;;  %s1176_s1 = inlined_call_operand.vmem [shape: f32[16,32], index: 1, kind: input, shape index: {}]   ;;  %s1177_s3 = inlined_call_operand.vmem [shape: f32[32,32], index: 3, kind: input, shape index: {}]   ;;  %s1178_s6 = inlined_call_operand.vmem [shape: f32[32,32], index: 6, kind: input, shape index: {}]   ;;  %s1179_s0 = inlined_call_operand.vmem [shape: f32[16,32], index: 0, kind: input, shape index: {}]   ;;  %s1180_s8 = inlined_call_operand.vmem [shape: f32[32,32], index: 8, kind: input, shape index: {}]   ;;  %s1181_s5 = inlined_call_operand.vmem [shape: f32[1,32], index: 5, kind: input, shape index: {}]   ;;  %s1182_s11 = inlined_call_operand.vmem [shape: f32[32,32], index: 11, kind: input, shape index: {}]   ;;  %s1183_s2 = inlined_call_operand.vmem [shape: f32[16,32], index: 2, kind: input, shape index: {}]   ;;  %s1184_s10 = inlined_call_operand.vmem [shape: f32[32,32], index: 10, kind: input, shape index: {}]   ;;  %s1185_s7 = inlined_call_operand.vmem [shape: f32[1,32], index: 7, kind: input, shape index: {}]   ;;  %s1186_s13 = inlined_call_operand.vmem [shape: f32[32,32], index: 13, kind: input, shape index: {}]   ;;  %s1187_s9 = inlined_call_operand.vmem [shape: f32[1,32], index: 9, kind: input, shape index: {}]   ;;  %s1188_s12 = inlined_call_operand.vmem [shape: f32[1,32], index: 12, kind: input, shape index: {}]   ;;  %s1189_s16 = inlined_call_operand.<no memory space> [shape: f32[1,1], index: 16, kind: input, shape index: {}]   ;;  %s1190_s14 = inlined_call_operand.vmem [shape: f32[1,32], index: 14, kind: input, shape index: {}]   ;;  %s1191_s15 = inlined_call_operand.vmem [shape: f32[1,32], index: 15, kind: input, shape index: {}]   ;;  %s1192_s17 = inlined_call_operand.vmem [shape: f32[16,1], index: 17, kind: output, shape index: {}]  }
   0x1   :  { %1195 = sst [smem:[#allocation3_spill]] %s1175_s4  ;;  %v60_v7 = vld [vmem:[%s1177_s3] sm:$0xff]  ;;  %v61_v8 = vld [vmem:[%s1177_s3 + $0x8] sm:$0xff]  ;;  %v62_v13 = vld [vmem:[%s1177_s3 + $0x10] sm:$0xff] }
   0x2   :  { %1196 = sst [smem:[#allocation4_spill]] %s1176_s1  ;;  %s1197_s26 = sld [smem:[#allocation3_spill]]  ;;  %v244_v9 = vld [vmem:[%s1178_s6] sm:$0xff]  ;;  %v245_v10 = vld [vmem:[%s1178_s6 + $0x8] sm:$0xff]  ;;  %v888_v11 = vpack.c.bf16 %v61_v8, %v60_v7  ;;  %v63_v14 = vld [vmem:[%s1177_s3 + $0x18] sm:$0xff] }
   0x3   :  { %s1198_s20 = sld [smem:[#allocation4_spill]]  ;;  %v896_v12 = vpack.c.bf16 %v245_v10, %v244_v9  ;;  %v892_v16 = vpack.c.bf16 %v63_v14, %v62_v13  ;;  %v58_v17 = vld [vmem:[%s1179_s0] sm:$0xff]  ;;  %v59_v18 = vld [vmem:[%s1179_s0 + $0x8] sm:$0xff]  ;;  %v246_v19 = vld [vmem:[%s1178_s6 + $0x10] sm:$0xff] }
   0x4   :  { %v247_v20 = vld [vmem:[%s1178_s6 + $0x18] sm:$0xff]  ;;  %v338_v22 = vld [vmem:[%s1180_s8] sm:$0xff]  ;;  %v339_v23 = vld [vmem:[%s1180_s8 + $0x8] sm:$0xff] }
   0x5   :  { %897 = vmatprep.subr.bf16.mxu1 %v896_v12  ;;  %v900_v21 = vpack.c.bf16 %v247_v20, %v246_v19  ;;  %v904_v24 = vpack.c.bf16 %v339_v23, %v338_v22  ;;  %v744_v25 = vld [vmem:[%s1181_s5] ss:$0 sm:$0xff]  ;;  %v340_v32 = vld [vmem:[%s1180_s8 + $0x10] sm:$0xff]  ;;  %v341_v33 = vld [vmem:[%s1180_s8 + $0x18] sm:$0xff] }
   0x6   :  { %899 = vmatpush3.bf16.msra.mxu1 %v896_v12  ;;  %v908_v34 = vpack.c.bf16 %v341_v33, %v340_v32  ;;  %v438_v35 = vld [vmem:[%s1182_s11] sm:$0xff]  ;;  %v439_v36 = vld [vmem:[%s1182_s11 + $0x8] sm:$0xff]  ;;  %v440_v37 = vld [vmem:[%s1182_s11 + $0x10] sm:$0xff]  ;;  %v22_v12 = vstv %s1189_s16 }
   0x7   :  { %901 = vmatprep.subr.bf16.mxu1 %v900_v21  ;;  %v912_v38 = vpack.c.bf16 %v439_v36, %v438_v35  ;;  %v441_v39 = vld [vmem:[%s1182_s11 + $0x18] sm:$0xff]  ;;  %v436_v40 = vld [vmem:[%s1183_s2] sm:$0xff]  ;;  %v433_v43 = vld [vmem:[%s1184_s10 + $0x8] sm:$0xff]  ;;  %23 = vst [vmem:[#allocation2] sm:$0x1] %v22_v12 }
   0x8   :  { %v66_v0 = vld [vmem:[%s1197_s26] sm:$0xff]  ;;  %v67_v1 = vld [vmem:[%s1197_s26 + $0x8] sm:$0xff]  ;;  %v68_v2 = vld [vmem:[%s1197_s26 + $0x10] sm:$0xff]  ;;  %v916_v41 = vpack.c.bf16 %v441_v39, %v440_v37 }
   0x9   :  { %v880_v3 = vpack.c.bf16 %v67_v1, %v66_v0  ;;  %v69_v4 = vld [vmem:[%s1197_s26 + $0x18] sm:$0xff]  ;;  %v64_v5 = vld [vmem:[%s1198_s20] sm:$0xff]  ;;  %v65_v15 = vld [vmem:[%s1198_s20 + $0x8] sm:$0xff] }
   0xa   :  { %v884_v6 = vpack.c.bf16 %v69_v4, %v68_v2  ;;  %811 = vmatprep.mubr.msk.f32.mxu0 %vm70_vm0, %v64_v5  ;;  %903 = vmatpush3.bf16.msra.mxu1 %v900_v21  ;;  %v432_v42 = vld [vmem:[%s1184_s10] sm:$0xff]  ;;  %v437_v45 = vld [vmem:[%s1183_s2 + $0x8] sm:$0xff]  ;;  %v434_v53 = vld [vmem:[%s1184_s10 + $0x10] sm:$0xff] }
   0xb   :  { %881 = vmatprep.subr.bf16.mxu0 %v880_v3  ;;  %905 = vmatprep.subr.bf16.mxu1 %v904_v24  ;;  %v920_v44 = vpack.c.bf16 %v433_v43, %v432_v42  ;;  %v745_v46 = vld [vmem:[%s1185_s7] ss:$0 sm:$0xff]  ;;  %v435_v54 = vld [vmem:[%s1184_s10 + $0x18] sm:$0xff]  ;;  %v616_v57 = vld [vmem:[%s1186_s13 + $0x8] sm:$0xff] }
   0xc   :  { %883 = vmatpush3.bf16.msra.mxu0 %v880_v3  ;;  %v924_v55 = vpack.c.bf16 %v435_v54, %v434_v53  ;;  %v615_v56 = vld [vmem:[%s1186_s13] sm:$0xff]  ;;  %v617_v2 = vld [vmem:[%s1186_s13 + $0x10] sm:$0xff]  ;;  %v618_v3 = vld [vmem:[%s1186_s13 + $0x18] sm:$0xff] }
   0xd   :  { %885 = vmatprep.subr.bf16.mxu0 %v884_v6  ;;  %v928_v58 = vpack.c.bf16 %v616_v57, %v615_v56  ;;  %v748_v59 = vld [vmem:[%s1187_s9] ss:$0 sm:$0xff]  ;;  %v932_v4 = vpack.c.bf16 %v618_v3, %v617_v2 }
   0xe   :  { %v755_v5 = vld [vmem:[%s1188_s12] ss:$0 sm:$0xff] }
   0xf   :  { %v756_v13 = vld [vmem:[%s1190_s14] ss:$0 sm:$0xff] }
  0x10   :  { %887 = vmatpush3.bf16.msra.mxu0 %v884_v6 }
  0x11   :  { %889 = vmatprep.subr.bf16.mxu0 %v888_v11 }
  0x13   :  { %812 = vmatmul.mubr.msk.f32.vlgmr.msra.gmra.mrb[0].mxu0 %vm70_vm0, %v65_v15 }
  0x14   :  { %891 = vmatpush3.bf16.msra.mxu0 %v888_v11  ;;  %822 = vmatprep.mubr.msk.f32.mxu0 %vm70_vm0, %v58_v17 }
  0x15   :  { %893 = vmatprep.subr.bf16.mxu0 %v892_v16 }
  0x18   :  { %895 = vmatpush3.bf16.msra.mxu0 %v892_v16 }
  0x19   :  { %913 = vmatprep.subr.bf16.mxu0 %v912_v38 }
  0x1b   :  { %823 = vmatmul.mubr.msk.f32.vlgmr.msra.gmra.mrb[0].mxu0 %vm70_vm0, %v59_v18  ;;  %v759_v18 = vld [vmem:[%s1191_s15] ss:$0 sm:$0xff] }
  0x1c   :  { %855 = vmatprep.mubr.msk.f32.mxu0 %vm70_vm0, %v436_v40  ;;  %915 = vmatpush3.bf16.msra.mxu0 %v912_v38 }
  0x1d   :  { %917 = vmatprep.subr.bf16.mxu0 %v916_v41 }
  0x20   :  { %919 = vmatpush3.bf16.msra.mxu0 %v916_v41 }
  0x21   :  { %921 = vmatprep.subr.bf16.mxu0 %v920_v44 }
  0x23   :  { %856 = vmatmul.mubr.msk.f32.vlgmr.msra.gmra.mrb[2].mxu0 %vm70_vm0, %v437_v45 }
  0x24   :  { %923 = vmatpush3.bf16.msra.mxu0 %v920_v44 }
  0x25   :  { %925 = vmatprep.subr.bf16.mxu0 %v924_v55 }
  0x28   :  { %927 = vmatpush3.bf16.msra.mxu0 %v924_v55 }
  0xee   :  { %v824_v26 = vpop.f32.mrb[0].mxu0 }
  0xef   :  { %v241_v27 = vadd.f32 %v824_v26, %v744_v25  ;;  %v224_v28 = vpop.f32.mrb[1].mxu0 }
  0xf0   :  { %v240_v29 = vadd.f32 %v744_v25, %v224_v28  ;;  %v760_v25 = vld [vmem:[#allocation2] ss:$0 sm:$0xff] }
  0xf1   :  { %v243_v31 = vmax.f32 %v241_v27, 0.0 }
  0xf2   :  { %v242_v30 = vmax.f32 %v240_v29, 0.0 }
  0xf4   :  { %833 = vmatprep.mubr.msk.f32.mxu1 %vm70_vm0, %v242_v30 }
  0xf5   :  { %834 = vmatmul.mubr.msk.f32.vlgmr.msra.gmra.mrb[0].mxu1 %vm70_vm0, %v243_v31 }
  0xf6   :  { %907 = vmatpush3.bf16.msra.mxu1 %v904_v24 }
  0xf7   :  { %909 = vmatprep.subr.bf16.mxu1 %v908_v34 }
  0xfa   :  { %911 = vmatpush3.bf16.msra.mxu1 %v908_v34 }
  0xfb   :  { %929 = vmatprep.subr.bf16.mxu1 %v928_v58 }
 0x1c8   :  { %v835_v47 = vpop.f32.mrb[0].mxu1 }
 0x1c9   :  { %v333_v48 = vadd.f32 %v835_v47, %v745_v46  ;;  %v327_v49 = vpop.f32.mrb[1].mxu1 }
 0x1ca   :  { %v328_v50 = vadd.f32 %v745_v46, %v327_v49 }
 0x1cb   :  { %v337_v52 = vmax.f32 %v333_v48, 0.0 }
 0x1cc   :  { %v336_v51 = vmax.f32 %v328_v50, 0.0 }
 0x1ce   :  { %844 = vmatprep.mubr.msk.f32.mxu1 %vm70_vm0, %v336_v51 }
 0x1cf   :  { %845 = vmatmul.mubr.msk.f32.vlgmr.msra.gmra.mrb[2].mxu1 %vm70_vm0, %v337_v52 }
 0x1d0   :  { %931 = vmatpush3.bf16.msra.mxu1 %v928_v58 }
 0x1d1   :  { %933 = vmatprep.subr.bf16.mxu1 %v932_v4 }
 0x1d4   :  { %935 = vmatpush3.bf16.msra.mxu1 %v932_v4 }
 0x2a2   :  { %v846_v60 = vpop.f32.mrb[2].mxu1 }
 0x2a3   :  { %v427_v61 = vadd.f32 %v846_v60, %v748_v59  ;;  %v421_v62 = vpop.f32.mrb[3].mxu1 }
 0x2a4   :  { %v422_v63 = vadd.f32 %v748_v59, %v421_v62 }
 0x2a5   :  { %v431_v1 = vmax.f32 %v427_v61, 0.0 }
 0x2a6   :  { %v430_v0 = vmax.f32 %v422_v63, 0.0 }
 0x2a8   :  { %866 = vmatprep.mubr.msk.f32.mxu0 %vm70_vm0, %v430_v0 }
 0x2a9   :  { %867 = vmatmul.mubr.msk.f32.vlgmr.msra.gmra.mrb[2].mxu0 %vm70_vm0, %v431_v1 }
 0x37c   :  { %v868_v6 = vpop.f32.mrb[2].mxu0 }
 0x37d   :  { %v612_v7 = vadd.f32 %v868_v6, %v755_v5  ;;  %v595_v8 = vpop.f32.mrb[3].mxu0 }
 0x37e   :  { %v611_v9 = vadd.f32 %v755_v5, %v595_v8 }
 0x37f   :  { %v614_v11 = vmax.f32 %v612_v7, 0.0 }
 0x380   :  { %v613_v10 = vmax.f32 %v611_v9, 0.0 }
 0x382   :  { %877 = vmatprep.mubr.msk.f32.mxu1 %vm70_vm0, %v613_v10 }
 0x383   :  { %878 = vmatmul.mubr.msk.f32.vlgmr.msra.gmra.mrb[4].mxu1 %vm70_vm0, %v614_v11 }
 0x456   :  { %v879_v14 = vpop.f32.mrb[4].mxu1 }
 0x457   :  { %v704_v15 = vadd.f32 %v879_v14, %v756_v13  ;;  %v698_v16 = vpop.f32.mrb[5].mxu1 }
 0x458   :  { %v699_v17 = vadd.f32 %v756_v13, %v698_v16 }
 0x459   :  { %v708_v19 = vmax.f32 %v704_v15, 0.0 }
 0x45a   :  { %v707_v20 = vmax.f32 %v699_v17, 0.0 }
 0x45b   :  { %v717_v23 = vmul.f32 %v759_v18, %v708_v19 }
 0x45c   :  { %v716_v21 = vmul.f32 %v759_v18, %v707_v20 }
 0x45d   :  { %v721_v24 = vsel %vm70_vm0, %v717_v23, 0.0 }
 0x45e   :  { %v718_v22 = vsel %vm70_vm0, %v716_v21, 0.0 }
 0x45f   :  { %719 = vadd.xlane.f32.xlu0 %v718_v22 }
 0x463   :  { %722 = vadd.xlane.f32.xlu0 %v721_v24 }
 0x4ec   :  { %v720_v26 = vpop.xlane.xlu0 %719 }
 0x4ed   :  { %v731_v27 = vadd.f32 %v760_v25, %v720_v26 }
 0x4ef   :  { %734 = vst.msk [vmem:[%s1192_s17] sm:$0xff] %vm733_vm1, %v731_v27 }
 0x4f0   :  { %v723_v28 = vpop.xlane.xlu0 %722 }
 0x4f1   :  { %v732_v29 = vadd.f32 %v760_v25, %v723_v28 }
 0x4f3   :  { %735 = vst.msk [vmem:[%s1192_s17 + $0x8] sm:$0xff] %vm733_vm1, %v732_v29 }

</bundles_post_ra>
